<compile_context>
chip_gen: v7x
topology: tpu7x:2x2x1
jax: 0.10.0
libtpu: 0.0.40
codegen_flags: <defaults>
</compile_context>

<pallas_src>
import numpy as np
import jax
import jax.numpy as jnp
from jax import lax
from jax.experimental import pallas as pl
from jax.experimental.pallas import tpu as pltpu

EPS = 1e-5

# MXU operand dtype.  On v6e/v7x set to jnp.bfloat16 to hit the bf16 MXU rate
# (f32 accumulation is kept via preferred_element_type; all elementwise BN/ReLU
# math stays f32, which also suits v5e's f32-only VPU/EUP).  f32 default keeps
# the 1e-3 comparison against the XLA reference tight at these shapes.
_DOT_DTYPE = jnp.float32


def _dot(a, b):
    return jnp.dot(a.astype(_DOT_DTYPE), b.astype(_DOT_DTYPE),
                   preferred_element_type=jnp.float32)


# ----------------------------- Pallas kernel -----------------------------

def residual2_kernel(x_ref, g_ref, s0_ref, t0_ref, w1_ref, c1_ref,
                     wcat_ref, c2_ref, w3_ref, co_ref, o_ref):
    """NB batch elements of Residual2, all in (channels, flat-spatial) layout.

    x_ref    : (NB, Cin, M)        NCHW input with HW flattened (M on lanes)
    g_ref    : (M, 9*Mo)           fused tap-selection matrix (col = t*Mo + mo)
    wcat_ref : (Cmid+Cout, 9*Cz)   block-stacked per-tap channel-mix weights
                                   (rows [0:Cout] -> conv4(x), rows [Cout:] -> conv2(a1))
    o_ref    : (1, Cout, NB*Mo)    lane-dense output slab
    """
    nb_total = x_ref.shape[0]
    cmid = w3_ref.shape[1]
    cout = w3_ref.shape[0]
    mo = g_ref.shape[1] // 9

    outs = []
    for nb in range(nb_total):                     # static unroll over the slab
        x = x_ref[nb]                              # (Cin, M)

        # bn0 -> relu -> conv1(1x1) -> bn1 -> relu    (BN scale/shift, bias folded)
        h0 = jnp.maximum(x * s0_ref[...] + t0_ref[...], 0.0)           # (Cin, M)
        a1 = jnp.maximum(_dot(w1_ref[...], h0) + c1_ref[...], 0.0)     # (Cmid, M)

        # Shared 3x3 / stride-2 / pad-1 gather for conv2(a1) AND conv4(x):
        # one im2col-in-VMEM matmul covering all 9 taps and both branches.
        z = jnp.concatenate([a1, x], axis=0)                           # (Cz, M)
        p = _dot(z, g_ref[...])                                        # (Cz, 9*Mo)

        # Restack (Cz, 9, Mo) -> (9*Cz, Mo) so the per-tap channel mixing is a
        # single K = 9*Cz matmul instead of 18 K=Cz micro-matmuls.
        p_stack = jnp.concatenate(
            [p[:, t * mo:(t + 1) * mo] for t in range(9)], axis=0)     # (9*Cz, Mo)
        acc = _dot(wcat_ref[...], p_stack)                             # (Cout+Cmid, Mo)

        res = acc[:cout]                                               # conv4(x) residual
        a2 = jnp.maximum(acc[cout:] + c2_ref[...], 0.0)                # bn2+relu(conv2)
        outs.append(_dot(w3_ref[...], a2) + res + co_ref[...])         # (Cout, Mo)

    # Single lane-dense store (last dim NB*Mo, a multiple of 128 when Mo < 128).
    o_ref[0] = jnp.concatenate(outs, axis=1).astype(o_ref.dtype)


# ----------------------------- wrapper / glue -----------------------------

def _bn_fold(gamma, beta, mean, var):
    scale = gamma / jnp.sqrt(var + EPS)
    shift = beta - mean * scale
    return scale, shift


def _tap_selection_matrix(H, W, Ho, Wo):
    """G[hi*W+wi, t*(Ho*Wo) + ho*Wo+wo] = 1 iff padded input (hi,wi) feeds output
    (ho,wo) at tap t = kh*3+kw of a 3x3 / stride-2 / pad-1 conv (OOB -> zero pad)."""
    g = np.zeros((9, H * W, Ho * Wo), np.float32)
    for kh in range(3):
        for kw in range(3):
            t = kh * 3 + kw
            for ho in range(Ho):
                hi = 2 * ho + kh - 1
                if hi < 0 or hi >= H:
                    continue
                for wo in range(Wo):
                    wi = 2 * wo + kw - 1
                    if wi < 0 or wi >= W:
                        continue
                    g[t, hi * W + wi, ho * Wo + wo] = 1.0
    # (9, M, Mo) -> (M, 9*Mo) with column index = t*Mo + mo (fused tap gather).
    return jnp.asarray(np.transpose(g, (1, 0, 2)).reshape(H * W, 9 * Ho * Wo))


def residual2_forward(x_nchw, P):
    N, Cin, H, W = x_nchw.shape
    Cmid = P["w1"].shape[0]
    Cout = P["w3"].shape[0]
    Ho, Wo = (H + 1) // 2, (W + 1) // 2
    M, Mo = H * W, Ho * Wo
    Cz, Cacc = Cmid + Cin, Cmid + Cout

    # Batch elements per grid step: make the stored last dim a multiple of 128
    # (lane-dense vst) and amortize per-grid-step overhead.
    NB = max(1, min(N, 128 // Mo)) if Mo < 128 else 1
    while N % NB:
        NB -= 1
    G = N // NB

    s0, t0 = _bn_fold(P["bn0_g"], P["bn0_b"], P["bn0_m"], P["bn0_v"])
    s1, t1 = _bn_fold(P["bn1_g"], P["bn1_b"], P["bn1_m"], P["bn1_v"])
    s2, t2 = _bn_fold(P["bn2_g"], P["bn2_b"], P["bn2_m"], P["bn2_v"])

    # Fold BN scales and conv biases into the channel-mixing matrices / shifts.
    w1p = s1[:, None] * P["w1"][:, :, 0, 0]                                 # (Cmid, Cin)
    c1 = (s1 * P["b1"] + t1)[:, None]                                       # (Cmid, 1)
    w2p = s2[None, :, None] * jnp.transpose(P["w2"], (2, 3, 0, 1)).reshape(9, Cmid, Cmid)
    c2 = (s2 * P["b2"] + t2)[:, None]                                       # (Cmid, 1)
    w3m = P["w3"][:, :, 0, 0]                                               # (Cout, Cmid)
    w4f = jnp.transpose(P["w4"], (2, 3, 0, 1)).reshape(9, Cout, Cin)        # (9, Cout, Cin)
    co = (P["b3"] + P["b4"])[:, None]                                       # (Cout, 1)

    # Block-stacked per-tap mixing weight: rows [0:Cout] read the x-part of Z
    # (conv4 residual), rows [Cout:] read the a1-part (conv2).  Taps flattened
    # into columns (col = t*Cz + c) to match the kernel's restacked gather.
    wz = jnp.zeros((9, Cacc, Cz), jnp.float32)
    wz = wz.at[:, :Cout, Cmid:].set(w4f)     # conv4 <- x
    wz = wz.at[:, Cout:, :Cmid].set(w2p)     # conv2 <- a1
    wcat = jnp.transpose(wz, (1, 0, 2)).reshape(Cacc, 9 * Cz)

    g_all = _tap_selection_matrix(H, W, Ho, Wo)                             # (M, 9*Mo)
    x3 = x_nchw.reshape(N, Cin, M).astype(jnp.float32)    # pure reshape, no transpose

    def full(shape):
        return pl.BlockSpec(shape, lambda *_: (0,) * len(shape))

    flops_per_n = 2 * (Cmid * Cin * M          # conv1 (1x1)
                       + Cz * M * 9 * Mo       # fused tap gather
                       + Cacc * 9 * Cz * Mo    # fused channel mixing
                       + Cout * Cmid * Mo)     # conv3 (1x1)
    bytes_accessed = 4 * (x3.size + g_all.size + wcat.size + w1p.size + w3m.size
                          + 2 * Cin + 2 * Cmid + Cout + G * Cout * NB * Mo)

    out = pl.pallas_call(
        residual2_kernel,
        out_shape=jax.ShapeDtypeStruct((G, Cout, NB * Mo), jnp.float32),
        grid=(G,),
        in_specs=[
            pl.BlockSpec((NB, Cin, M), lambda g: (g, 0, 0)),   # x slab (NB batch elems)
            full((M, 9 * Mo)),                                 # fused tap-selection matrix
            full((Cin, 1)), full((Cin, 1)),                    # s0, t0
            full((Cmid, Cin)), full((Cmid, 1)),                # w1', c1
            full((Cacc, 9 * Cz)),                              # stacked conv2/conv4 weights
            full((Cmid, 1)),                                   # c2
            full((Cout, Cmid)),                                # w3
            full((Cout, 1)),                                   # b3 + b4
        ],
        out_specs=pl.BlockSpec((1, Cout, NB * Mo), lambda g: (g, 0, 0)),
        compiler_params=pltpu.CompilerParams(
            dimension_semantics=("parallel",)),
        cost_estimate=pl.CostEstimate(flops=N * flops_per_n, transcendentals=0,
                                      bytes_accessed=bytes_accessed),
    )(x3, g_all, s0[:, None], t0[:, None], w1p, c1, wcat, c2, w3m, co)

    # (G, Cout, NB*Mo) -> (N, Cout, Ho, Wo): un-interleave the lane-dense slab.
    out = out.reshape(G, Cout, NB, Mo).transpose(0, 2, 1, 3)
    return out.reshape(N, Cout, Ho, Wo)


# ----------------------------- reference (pure JAX) -----------------------------

def residual2_reference(x_nchw, P):
    x = jnp.transpose(x_nchw, (0, 2, 3, 1)).astype(jnp.float32)

    def bn(z, g, b, m, v):
        return (z - m) / jnp.sqrt(v + EPS) * g + b

    def conv(z, w, b, stride, pad):
        y = lax.conv_general_dilated(
            z, jnp.transpose(w, (2, 3, 1, 0)),
            window_strides=(stride, stride),
            padding=[(pad, pad), (pad, pad)],
            dimension_numbers=("NHWC", "HWIO", "NHWC"))
        return y + b

    out = jnp.maximum(bn(x, P["bn0_g"], P["bn0_b"], P["bn0_m"], P["bn0_v"]), 0.0)
    out = conv(out, P["w1"], P["b1"], 1, 0)
    out = jnp.maximum(bn(out, P["bn1_g"], P["bn1_b"], P["bn1_m"], P["bn1_v"]), 0.0)
    out = conv(out, P["w2"], P["b2"], 2, 1)
    out = jnp.maximum(bn(out, P["bn2_g"], P["bn2_b"], P["bn2_m"], P["bn2_v"]), 0.0)
    out = conv(out, P["w3"], P["b3"], 1, 0)
    resid = conv(x, P["w4"], P["b4"], 2, 1)
    return jnp.transpose(out + resid, (0, 3, 1, 2))


# ----------------------------- setup & main -----------------------------

def init_params(key, cin, cout):
    cmid = cout // 2
    ks = iter(jax.random.split(key, 32))

    def nrm(shape, s=0.1):
        return s * jax.random.normal(next(ks), shape, jnp.float32)

    def bn(prefix, c, d):
        d[prefix + "_g"] = 1.0 + nrm((c,))
        d[prefix + "_b"] = nrm((c,))
        d[prefix + "_m"] = nrm((c,))
        d[prefix + "_v"] = 1.0 + 0.1 * jax.random.uniform(next(ks), (c,), jnp.float32)

    P = {}
    bn("bn0", cin, P)
    P["w1"], P["b1"] = nrm((cmid, cin, 1, 1)), nrm((cmid,))
    bn("bn1", cmid, P)
    P["w2"], P["b2"] = nrm((cmid, cmid, 3, 3)), nrm((cmid,))
    bn("bn2", cmid, P)
    P["w3"], P["b3"] = nrm((cout, cmid, 1, 1)), nrm((cout,))
    P["w4"], P["b4"] = nrm((cout, cin, 3, 3)), nrm((cout,))
    return P


if __name__ == "__main__":
    N, Cin, H, W = 2, 4, 16, 16          # numIn = 4
    Cout = 8                             # numOut = 8

    key = jax.random.PRNGKey(0)
    kx, kp = jax.random.split(key)
    x = jax.random.normal(kx, (N, Cin, H, W), jnp.float32)   # NCHW like PyTorch
    P = init_params(kp, Cin, Cout)

    out = residual2_forward(x, P)
    out = jax.block_until_ready(out)

    ref = jax.block_until_ready(residual2_reference(x, P))
    assert out.shape == (N, Cout, H // 2, W // 2), out.shape
    assert jnp.allclose(out, ref, rtol=1e-3, atol=1e-3), float(jnp.abs(out - ref).max())

    print("KERNEL_OK")
</pallas_src>

<mosaic_0001>
module attributes {stable_mosaic.version = 11 : i64} {
  func.func @residual2_kernel(%arg0: i32, %arg1: memref<2x4x256xf32, #tpu.memory_space<vmem>>, %arg2: memref<256x576xf32, #tpu.memory_space<vmem>>, %arg3: memref<4x1xf32, #tpu.memory_space<vmem>>, %arg4: memref<4x1xf32, #tpu.memory_space<vmem>>, %arg5: memref<4x4xf32, #tpu.memory_space<vmem>>, %arg6: memref<4x1xf32, #tpu.memory_space<vmem>>, %arg7: memref<12x72xf32, #tpu.memory_space<vmem>>, %arg8: memref<4x1xf32, #tpu.memory_space<vmem>>, %arg9: memref<8x4xf32, #tpu.memory_space<vmem>>, %arg10: memref<8x1xf32, #tpu.memory_space<vmem>>, %arg11: memref<1x8x128xf32, #tpu.memory_space<vmem>>) attributes {dimension_semantics = [#tpu.dimension_semantics<parallel>], iteration_bounds = array<i64: 1>, scalar_prefetch = 0 : i64, scratch_operands = 0 : i64, tpu.core_type = #tpu.core_type<tc>, window_params = [{transform_indices = @transform_0, window_bounds = array<i64: 2, 4, 256>}, {pipeline_mode = #tpu.pipeline_mode<synchronous>, transform_indices = @transform_1, window_bounds = array<i64: 256, 576>}, {pipeline_mode = #tpu.pipeline_mode<synchronous>, transform_indices = @transform_2, window_bounds = array<i64: 4, 1>}, {pipeline_mode = #tpu.pipeline_mode<synchronous>, transform_indices = @transform_3, window_bounds = array<i64: 4, 1>}, {pipeline_mode = #tpu.pipeline_mode<synchronous>, transform_indices = @transform_4, window_bounds = array<i64: 4, 4>}, {pipeline_mode = #tpu.pipeline_mode<synchronous>, transform_indices = @transform_5, window_bounds = array<i64: 4, 1>}, {pipeline_mode = #tpu.pipeline_mode<synchronous>, transform_indices = @transform_6, window_bounds = array<i64: 12, 72>}, {pipeline_mode = #tpu.pipeline_mode<synchronous>, transform_indices = @transform_7, window_bounds = array<i64: 4, 1>}, {pipeline_mode = #tpu.pipeline_mode<synchronous>, transform_indices = @transform_8, window_bounds = array<i64: 8, 4>}, {pipeline_mode = #tpu.pipeline_mode<synchronous>, transform_indices = @transform_9, window_bounds = array<i64: 8, 1>}, {transform_indices = @transform_10, window_bounds = array<i64: 1, 8, 128>}]} {
    %c0 = arith.constant 0 : index
    %c0_0 = arith.constant 0 : index
    %c0_1 = arith.constant 0 : index
    %0 = vector.load %arg1[%c0, %c0_0, %c0_1] : memref<2x4x256xf32, #tpu.memory_space<vmem>>, vector<1x4x256xf32>
    %1 = vector.shape_cast %0 : vector<1x4x256xf32> to vector<4x256xf32>
    %c0_2 = arith.constant 0 : index
    %c0_3 = arith.constant 0 : index
    %2 = vector.load %arg3[%c0_2, %c0_3] : memref<4x1xf32, #tpu.memory_space<vmem>>, vector<4x1xf32>
    %3 = vector.broadcast %2 : vector<4x1xf32> to vector<4x256xf32>
    %4 = arith.mulf %1, %3 : vector<4x256xf32>
    %c0_4 = arith.constant 0 : index
    %c0_5 = arith.constant 0 : index
    %5 = vector.load %arg4[%c0_4, %c0_5] : memref<4x1xf32, #tpu.memory_space<vmem>>, vector<4x1xf32>
    %6 = vector.broadcast %5 : vector<4x1xf32> to vector<4x256xf32>
    %7 = arith.addf %4, %6 : vector<4x256xf32>
    %cst = arith.constant 0.000000e+00 : f32
    %8 = vector.broadcast %cst : f32 to vector<4x256xf32>
    %9 = arith.maximumf %7, %8 : vector<4x256xf32>
    %c0_6 = arith.constant 0 : index
    %c0_7 = arith.constant 0 : index
    %10 = vector.load %arg5[%c0_6, %c0_7] : memref<4x4xf32, #tpu.memory_space<vmem>>, vector<4x4xf32>
    %cst_8 = arith.constant dense<0.000000e+00> : vector<4x256xf32>
    %11 = tpu.matmul %10, %9, %cst_8 {dimension_numbers = #tpu.dot_dimension_numbers<[1], [0], [0], [1], [0, 0, 1, 1], [], []>} : vector<4x4xf32>, vector<4x256xf32>, vector<4x256xf32> -> vector<4x256xf32>
    %c0_9 = arith.constant 0 : index
    %c0_10 = arith.constant 0 : index
    %12 = vector.load %arg6[%c0_9, %c0_10] : memref<4x1xf32, #tpu.memory_space<vmem>>, vector<4x1xf32>
    %13 = vector.broadcast %12 : vector<4x1xf32> to vector<4x256xf32>
    %14 = arith.addf %11, %13 : vector<4x256xf32>
    %cst_11 = arith.constant 0.000000e+00 : f32
    %15 = vector.broadcast %cst_11 : f32 to vector<4x256xf32>
    %16 = arith.maximumf %14, %15 : vector<4x256xf32>
    %17 = tpu.concatenate %16, %1 in 0 : vector<4x256xf32>, vector<4x256xf32> -> vector<8x256xf32>
    %c0_12 = arith.constant 0 : index
    %c0_13 = arith.constant 0 : index
    %18 = vector.load %arg2[%c0_12, %c0_13] : memref<256x576xf32, #tpu.memory_space<vmem>>, vector<256x576xf32>
    %cst_14 = arith.constant dense<0.000000e+00> : vector<8x576xf32>
    %19 = tpu.matmul %17, %18, %cst_14 {dimension_numbers = #tpu.dot_dimension_numbers<[1], [0], [0], [1], [0, 0, 1, 1], [], []>} : vector<8x256xf32>, vector<256x576xf32>, vector<8x576xf32> -> vector<8x576xf32>
    %20 = vector.extract_strided_slice %19 {offsets = [0, 0], sizes = [8, 64], strides = [1, 1]} : vector<8x576xf32> to vector<8x64xf32>
    %21 = vector.extract_strided_slice %19 {offsets = [0, 64], sizes = [8, 64], strides = [1, 1]} : vector<8x576xf32> to vector<8x64xf32>
    %22 = vector.extract_strided_slice %19 {offsets = [0, 128], sizes = [8, 64], strides = [1, 1]} : vector<8x576xf32> to vector<8x64xf32>
    %23 = vector.extract_strided_slice %19 {offsets = [0, 192], sizes = [8, 64], strides = [1, 1]} : vector<8x576xf32> to vector<8x64xf32>
    %24 = vector.extract_strided_slice %19 {offsets = [0, 256], sizes = [8, 64], strides = [1, 1]} : vector<8x576xf32> to vector<8x64xf32>
    %25 = vector.extract_strided_slice %19 {offsets = [0, 320], sizes = [8, 64], strides = [1, 1]} : vector<8x576xf32> to vector<8x64xf32>
    %26 = vector.extract_strided_slice %19 {offsets = [0, 384], sizes = [8, 64], strides = [1, 1]} : vector<8x576xf32> to vector<8x64xf32>
    %27 = vector.extract_strided_slice %19 {offsets = [0, 448], sizes = [8, 64], strides = [1, 1]} : vector<8x576xf32> to vector<8x64xf32>
    %28 = vector.extract_strided_slice %19 {offsets = [0, 512], sizes = [8, 64], strides = [1, 1]} : vector<8x576xf32> to vector<8x64xf32>
    %29 = tpu.concatenate %20, %21, %22, %23, %24, %25, %26, %27, %28 in 0 : vector<8x64xf32>, vector<8x64xf32>, vector<8x64xf32>, vector<8x64xf32>, vector<8x64xf32>, vector<8x64xf32>, vector<8x64xf32>, vector<8x64xf32>, vector<8x64xf32> -> vector<72x64xf32>
    %c0_15 = arith.constant 0 : index
    %c0_16 = arith.constant 0 : index
    %30 = vector.load %arg7[%c0_15, %c0_16] : memref<12x72xf32, #tpu.memory_space<vmem>>, vector<12x72xf32>
    %cst_17 = arith.constant dense<0.000000e+00> : vector<12x64xf32>
    %31 = tpu.matmul %30, %29, %cst_17 {dimension_numbers = #tpu.dot_dimension_numbers<[1], [0], [0], [1], [0, 0, 1, 1], [], []>} : vector<12x72xf32>, vector<72x64xf32>, vector<12x64xf32> -> vector<12x64xf32>
    %32 = vector.extract_strided_slice %31 {offsets = [0, 0], sizes = [8, 64], strides = [1, 1]} : vector<12x64xf32> to vector<8x64xf32>
    %33 = vector.extract_strided_slice %31 {offsets = [8, 0], sizes = [4, 64], strides = [1, 1]} : vector<12x64xf32> to vector<4x64xf32>
    %c0_18 = arith.constant 0 : index
    %c0_19 = arith.constant 0 : index
    %34 = vector.load %arg8[%c0_18, %c0_19] : memref<4x1xf32, #tpu.memory_space<vmem>>, vector<4x1xf32>
    %35 = vector.broadcast %34 : vector<4x1xf32> to vector<4x64xf32>
    %36 = arith.addf %33, %35 : vector<4x64xf32>
    %cst_20 = arith.constant 0.000000e+00 : f32
    %37 = vector.broadcast %cst_20 : f32 to vector<4x64xf32>
    %38 = arith.maximumf %36, %37 : vector<4x64xf32>
    %c0_21 = arith.constant 0 : index
    %c0_22 = arith.constant 0 : index
    %39 = vector.load %arg9[%c0_21, %c0_22] : memref<8x4xf32, #tpu.memory_space<vmem>>, vector<8x4xf32>
    %cst_23 = arith.constant dense<0.000000e+00> : vector<8x64xf32>
    %40 = tpu.matmul %39, %38, %cst_23 {dimension_numbers = #tpu.dot_dimension_numbers<[1], [0], [0], [1], [0, 0, 1, 1], [], []>} : vector<8x4xf32>, vector<4x64xf32>, vector<8x64xf32> -> vector<8x64xf32>
    %41 = arith.addf %40, %32 : vector<8x64xf32>
    %c0_24 = arith.constant 0 : index
    %c0_25 = arith.constant 0 : index
    %42 = vector.load %arg10[%c0_24, %c0_25] : memref<8x1xf32, #tpu.memory_space<vmem>>, vector<8x1xf32>
    %43 = vector.broadcast %42 : vector<8x1xf32> to vector<8x64xf32>
    %44 = arith.addf %41, %43 : vector<8x64xf32>
    %c1 = arith.constant 1 : index
    %c0_26 = arith.constant 0 : index
    %c0_27 = arith.constant 0 : index
    %45 = vector.load %arg1[%c1, %c0_26, %c0_27] : memref<2x4x256xf32, #tpu.memory_space<vmem>>, vector<1x4x256xf32>
    %46 = vector.shape_cast %45 : vector<1x4x256xf32> to vector<4x256xf32>
    %c0_28 = arith.constant 0 : index
    %c0_29 = arith.constant 0 : index
    %47 = vector.load %arg3[%c0_28, %c0_29] : memref<4x1xf32, #tpu.memory_space<vmem>>, vector<4x1xf32>
    %48 = vector.broadcast %47 : vector<4x1xf32> to vector<4x256xf32>
    %49 = arith.mulf %46, %48 : vector<4x256xf32>
    %c0_30 = arith.constant 0 : index
    %c0_31 = arith.constant 0 : index
    %50 = vector.load %arg4[%c0_30, %c0_31] : memref<4x1xf32, #tpu.memory_space<vmem>>, vector<4x1xf32>
    %51 = vector.broadcast %50 : vector<4x1xf32> to vector<4x256xf32>
    %52 = arith.addf %49, %51 : vector<4x256xf32>
    %cst_32 = arith.constant 0.000000e+00 : f32
    %53 = vector.broadcast %cst_32 : f32 to vector<4x256xf32>
    %54 = arith.maximumf %52, %53 : vector<4x256xf32>
    %c0_33 = arith.constant 0 : index
    %c0_34 = arith.constant 0 : index
    %55 = vector.load %arg5[%c0_33, %c0_34] : memref<4x4xf32, #tpu.memory_space<vmem>>, vector<4x4xf32>
    %cst_35 = arith.constant dense<0.000000e+00> : vector<4x256xf32>
    %56 = tpu.matmul %55, %54, %cst_35 {dimension_numbers = #tpu.dot_dimension_numbers<[1], [0], [0], [1], [0, 0, 1, 1], [], []>} : vector<4x4xf32>, vector<4x256xf32>, vector<4x256xf32> -> vector<4x256xf32>
    %c0_36 = arith.constant 0 : index
    %c0_37 = arith.constant 0 : index
    %57 = vector.load %arg6[%c0_36, %c0_37] : memref<4x1xf32, #tpu.memory_space<vmem>>, vector<4x1xf32>
    %58 = vector.broadcast %57 : vector<4x1xf32> to vector<4x256xf32>
    %59 = arith.addf %56, %58 : vector<4x256xf32>
    %cst_38 = arith.constant 0.000000e+00 : f32
    %60 = vector.broadcast %cst_38 : f32 to vector<4x256xf32>
    %61 = arith.maximumf %59, %60 : vector<4x256xf32>
    %62 = tpu.concatenate %61, %46 in 0 : vector<4x256xf32>, vector<4x256xf32> -> vector<8x256xf32>
    %c0_39 = arith.constant 0 : index
    %c0_40 = arith.constant 0 : index
    %63 = vector.load %arg2[%c0_39, %c0_40] : memref<256x576xf32, #tpu.memory_space<vmem>>, vector<256x576xf32>
    %cst_41 = arith.constant dense<0.000000e+00> : vector<8x576xf32>
    %64 = tpu.matmul %62, %63, %cst_41 {dimension_numbers = #tpu.dot_dimension_numbers<[1], [0], [0], [1], [0, 0, 1, 1], [], []>} : vector<8x256xf32>, vector<256x576xf32>, vector<8x576xf32> -> vector<8x576xf32>
    %65 = vector.extract_strided_slice %64 {offsets = [0, 0], sizes = [8, 64], strides = [1, 1]} : vector<8x576xf32> to vector<8x64xf32>
    %66 = vector.extract_strided_slice %64 {offsets = [0, 64], sizes = [8, 64], strides = [1, 1]} : vector<8x576xf32> to vector<8x64xf32>
    %67 = vector.extract_strided_slice %64 {offsets = [0, 128], sizes = [8, 64], strides = [1, 1]} : vector<8x576xf32> to vector<8x64xf32>
    %68 = vector.extract_strided_slice %64 {offsets = [0, 192], sizes = [8, 64], strides = [1, 1]} : vector<8x576xf32> to vector<8x64xf32>
    %69 = vector.extract_strided_slice %64 {offsets = [0, 256], sizes = [8, 64], strides = [1, 1]} : vector<8x576xf32> to vector<8x64xf32>
    %70 = vector.extract_strided_slice %64 {offsets = [0, 320], sizes = [8, 64], strides = [1, 1]} : vector<8x576xf32> to vector<8x64xf32>
    %71 = vector.extract_strided_slice %64 {offsets = [0, 384], sizes = [8, 64], strides = [1, 1]} : vector<8x576xf32> to vector<8x64xf32>
    %72 = vector.extract_strided_slice %64 {offsets = [0, 448], sizes = [8, 64], strides = [1, 1]} : vector<8x576xf32> to vector<8x64xf32>
    %73 = vector.extract_strided_slice %64 {offsets = [0, 512], sizes = [8, 64], strides = [1, 1]} : vector<8x576xf32> to vector<8x64xf32>
    %74 = tpu.concatenate %65, %66, %67, %68, %69, %70, %71, %72, %73 in 0 : vector<8x64xf32>, vector<8x64xf32>, vector<8x64xf32>, vector<8x64xf32>, vector<8x64xf32>, vector<8x64xf32>, vector<8x64xf32>, vector<8x64xf32>, vector<8x64xf32> -> vector<72x64xf32>
    %c0_42 = arith.constant 0 : index
    %c0_43 = arith.constant 0 : index
    %75 = vector.load %arg7[%c0_42, %c0_43] : memref<12x72xf32, #tpu.memory_space<vmem>>, vector<12x72xf32>
    %cst_44 = arith.constant dense<0.000000e+00> : vector<12x64xf32>
    %76 = tpu.matmul %75, %74, %cst_44 {dimension_numbers = #tpu.dot_dimension_numbers<[1], [0], [0], [1], [0, 0, 1, 1], [], []>} : vector<12x72xf32>, vector<72x64xf32>, vector<12x64xf32> -> vector<12x64xf32>
    %77 = vector.extract_strided_slice %76 {offsets = [0, 0], sizes = [8, 64], strides = [1, 1]} : vector<12x64xf32> to vector<8x64xf32>
    %78 = vector.extract_strided_slice %76 {offsets = [8, 0], sizes = [4, 64], strides = [1, 1]} : vector<12x64xf32> to vector<4x64xf32>
    %c0_45 = arith.constant 0 : index
    %c0_46 = arith.constant 0 : index
    %79 = vector.load %arg8[%c0_45, %c0_46] : memref<4x1xf32, #tpu.memory_space<vmem>>, vector<4x1xf32>
    %80 = vector.broadcast %79 : vector<4x1xf32> to vector<4x64xf32>
    %81 = arith.addf %78, %80 : vector<4x64xf32>
    %cst_47 = arith.constant 0.000000e+00 : f32
    %82 = vector.broadcast %cst_47 : f32 to vector<4x64xf32>
    %83 = arith.maximumf %81, %82 : vector<4x64xf32>
    %c0_48 = arith.constant 0 : index
    %c0_49 = arith.constant 0 : index
    %84 = vector.load %arg9[%c0_48, %c0_49] : memref<8x4xf32, #tpu.memory_space<vmem>>, vector<8x4xf32>
    %cst_50 = arith.constant dense<0.000000e+00> : vector<8x64xf32>
    %85 = tpu.matmul %84, %83, %cst_50 {dimension_numbers = #tpu.dot_dimension_numbers<[1], [0], [0], [1], [0, 0, 1, 1], [], []>} : vector<8x4xf32>, vector<4x64xf32>, vector<8x64xf32> -> vector<8x64xf32>
    %86 = arith.addf %85, %77 : vector<8x64xf32>
    %c0_51 = arith.constant 0 : index
    %c0_52 = arith.constant 0 : index
    %87 = vector.load %arg10[%c0_51, %c0_52] : memref<8x1xf32, #tpu.memory_space<vmem>>, vector<8x1xf32>
    %88 = vector.broadcast %87 : vector<8x1xf32> to vector<8x64xf32>
    %89 = arith.addf %86, %88 : vector<8x64xf32>
    %90 = tpu.concatenate %44, %89 in 1 : vector<8x64xf32>, vector<8x64xf32> -> vector<8x128xf32>
    %c0_53 = arith.constant 0 : index
    %c0_54 = arith.constant 0 : index
    %c0_55 = arith.constant 0 : index
    %91 = vector.load %arg11[%c0_53, %c0_54, %c0_55] : memref<1x8x128xf32, #tpu.memory_space<vmem>>, vector<1x8x128xf32>
    %92 = vector.shape_cast %91 : vector<1x8x128xf32> to vector<8x128xf32>
    %93 = vector.shape_cast %90 : vector<8x128xf32> to vector<1x8x128xf32>
    tpu.vector_store %arg11[%c0_53, %c0_54, %c0_55], %93 {strides = array<i32>} : memref<1x8x128xf32, #tpu.memory_space<vmem>>, vector<1x8x128xf32>,
    return
  }
  func.func @transform_0(%arg0: i32) -> (i32, i32, i32) {
    %c0_i32 = arith.constant 0 : i32
    %c0_i32_0 = arith.constant 0 : i32
    %c0_i32_1 = arith.constant 0 : i32
    return %arg0, %c0_i32, %c0_i32_0 : i32, i32, i32
  }
  func.func @transform_1(%arg0: i32) -> (i32, i32) {
    %c0_i32 = arith.constant 0 : i32
    %c0_i32_0 = arith.constant 0 : i32
    %c0_i32_1 = arith.constant 0 : i32
    return %c0_i32, %c0_i32_0 : i32, i32
  }
  func.func @transform_2(%arg0: i32) -> (i32, i32) {
    %c0_i32 = arith.constant 0 : i32
    %c0_i32_0 = arith.constant 0 : i32
    %c0_i32_1 = arith.constant 0 : i32
    return %c0_i32, %c0_i32_0 : i32, i32
  }
  func.func @transform_3(%arg0: i32) -> (i32, i32) {
    %c0_i32 = arith.constant 0 : i32
    %c0_i32_0 = arith.constant 0 : i32
    %c0_i32_1 = arith.constant 0 : i32
    return %c0_i32, %c0_i32_0 : i32, i32
  }
  func.func @transform_4(%arg0: i32) -> (i32, i32) {
    %c0_i32 = arith.constant 0 : i32
    %c0_i32_0 = arith.constant 0 : i32
    %c0_i32_1 = arith.constant 0 : i32
    return %c0_i32, %c0_i32_0 : i32, i32
  }
  func.func @transform_5(%arg0: i32) -> (i32, i32) {
    %c0_i32 = arith.constant 0 : i32
    %c0_i32_0 = arith.constant 0 : i32
    %c0_i32_1 = arith.constant 0 : i32
    return %c0_i32, %c0_i32_0 : i32, i32
  }
  func.func @transform_6(%arg0: i32) -> (i32, i32) {
    %c0_i32 = arith.constant 0 : i32
    %c0_i32_0 = arith.constant 0 : i32
    %c0_i32_1 = arith.constant 0 : i32
    return %c0_i32, %c0_i32_0 : i32, i32
  }
  func.func @transform_7(%arg0: i32) -> (i32, i32) {
    %c0_i32 = arith.constant 0 : i32
    %c0_i32_0 = arith.constant 0 : i32
    %c0_i32_1 = arith.constant 0 : i32
    return %c0_i32, %c0_i32_0 : i32, i32
  }
  func.func @transform_8(%arg0: i32) -> (i32, i32) {
    %c0_i32 = arith.constant 0 : i32
    %c0_i32_0 = arith.constant 0 : i32
    %c0_i32_1 = arith.constant 0 : i32
    return %c0_i32, %c0_i32_0 : i32, i32
  }
  func.func @transform_9(%arg0: i32) -> (i32, i32) {
    %c0_i32 = arith.constant 0 : i32
    %c0_i32_0 = arith.constant 0 : i32
    %c0_i32_1 = arith.constant 0 : i32
    return %c0_i32, %c0_i32_0 : i32, i32
  }
  func.func @transform_10(%arg0: i32) -> (i32, i32, i32) {
    %c0_i32 = arith.constant 0 : i32
    %c0_i32_0 = arith.constant 0 : i32
    %c0_i32_1 = arith.constant 0 : i32
    return %arg0, %c0_i32, %c0_i32_0 : i32, i32, i32
  }
}

</mosaic_0001>

<bundles_post_ra>
// kernel: tpu_custom_call.1
= control target key start
LH: loop header
LB: loop body
LE: loop exit
PB: predicated region body
PF: predicated region fallthrough
CT: control target
= control target key end

     0   :  { %v1764_v1 = vmov 0   ;;  %s2749_s0 = inlined_call_operand.vmem [shape: f32[2,4,256], index: 0, kind: input, shape index: {}]   ;;  %s2750_s1 = inlined_call_operand.vmem [shape: f32[256,576], index: 1, kind: input, shape index: {}]   ;;  %s2751_s2 = inlined_call_operand.vmem [shape: f32[4,1], index: 2, kind: input, shape index: {}]   ;;  %s2752_s3 = inlined_call_operand.vmem [shape: f32[4,1], index: 3, kind: input, shape index: {}]   ;;  %s2753_s4 = inlined_call_operand.vmem [shape: f32[4,4], index: 4, kind: input, shape index: {}]   ;;  %s2754_s5 = inlined_call_operand.vmem [shape: f32[4,1], index: 5, kind: input, shape index: {}]   ;;  %s2755_s6 = inlined_call_operand.vmem [shape: f32[12,72], index: 6, kind: input, shape index: {}]   ;;  %s2756_s7 = inlined_call_operand.vmem [shape: f32[4,1], index: 7, kind: input, shape index: {}]   ;;  %s2757_s8 = inlined_call_operand.vmem [shape: f32[8,4], index: 8, kind: input, shape index: {}]   ;;  %s2758_s9 = inlined_call_operand.vmem [shape: f32[8,1], index: 9, kind: input, shape index: {}]   ;;  %s2759_s10 = inlined_call_operand.hbm [shape: f32[1,8,128], index: 10, kind: output, shape index: {}]  }
   0x1   :  { %v37_v0 = vld [vmem:[%s2751_s2] sm:$0xf]  ;;  %1736 = vset.pattern.permute.xlu0 %v1764_v1  ;;  %1737 = vset.pattern.permute.xlu1 %v1764_v1 }
   0x2   :  { %15 = vsyncpa [#allocation3], 0  ;;  %40 = vperm.xlu0 %1736, %v37_v0   ;;  %v51_v2 = vld [vmem:[%s2752_s3] sm:$0xf]  ;;  %v2760_v3 = vmov 0.0   ;;  %v165_v5 = vld [vmem:[%s2750_s1 + $0x18] sm:$0xff] }
   0x3   :  { %148 = vmatprep.mubr.f32.mxu1 %v2760_v3  ;;  %v67_v4 = vld [vmem:[%s2754_s5] sm:$0xf]  ;;  %v164_v7 = vld [vmem:[%s2750_s1 + $0x10] sm:$0xff]  ;;  %v169_v8 = vld [vmem:[%s2750_s1 + $0x38] sm:$0xff]  ;;  %vm79_vm0 = vcmask 1043456   ;;  %vm75_vm1 = vcmask 31744  }
   0x4   :  { %70 = vperm.xlu1 %1737, %v67_v4   ;;  %v170_v6 = vld [vmem:[%s2750_s1 + $0x40] sm:$0xff]  ;;  %v1849_v10 = vpack.c.bf16 %v169_v8, %v164_v7  ;;  %v175_v11 = vld [vmem:[%s2750_s1 + $0x68] sm:$0xff]  ;;  %v180_v12 = vld [vmem:[%s2750_s1 + $0x90] sm:$0xff]  ;;  %vm552_vm2 = vcmask 588800   ;;  %vm1768_vm3 = vmmov 0   ;;  %vm1198_vm4 = vcmask 523264  }
   0x5   :  { %v1847_v9 = vpack.c.bf16 %v170_v6, %v165_v5  ;;  %v174_v13 = vld [vmem:[%s2750_s1 + $0x60] sm:$0xff]  ;;  %v1862_v14 = vpack.c.bf16 %v180_v12, %v175_v11  ;;  %v179_v15 = vld [vmem:[%s2750_s1 + $0x88] sm:$0xff]  ;;  %v185_v17 = vld [vmem:[%s2750_s1 + $0xb8] sm:$0xff] }
   0x6   :  { %54 = vperm.xlu0 %1736, %v51_v2   ;;  %v1867_v16 = vpack.c.bf16 %v179_v15, %v174_v13  ;;  %v190_v18 = vld [vmem:[%s2750_s1 + $0xe0] sm:$0xff]  ;;  %v184_v19 = vld [vmem:[%s2750_s1 + $0xb0] sm:$0xff]  ;;  %v189_v21 = vld [vmem:[%s2750_s1 + $0xd8] sm:$0xff] }
   0x7   :  { %1443 = vmatprep.subr.bf16.mxu0 %v1847_v9  ;;  %v1880_v20 = vpack.c.bf16 %v190_v18, %v185_v17  ;;  %v1885_v22 = vpack.c.bf16 %v189_v21, %v184_v19  ;;  %v195_v23 = vld [vmem:[%s2750_s1 + $0x108] sm:$0xff]  ;;  %v200_v24 = vld [vmem:[%s2750_s1 + $0x130] sm:$0xff]  ;;  %v194_v25 = vld [vmem:[%s2750_s1 + $0x100] sm:$0xff] }
   0x8   :  { %1445 = vmatpush1.bf16.msra.mxu0 %v1849_v10  ;;  %v1898_v26 = vpack.c.bf16 %v200_v24, %v195_v23  ;;  %v199_v27 = vld [vmem:[%s2750_s1 + $0x128] sm:$0xff]  ;;  %v205_v29 = vld [vmem:[%s2750_s1 + $0x158] sm:$0xff]  ;;  %v210_v30 = vld [vmem:[%s2750_s1 + $0x180] sm:$0xff] }
   0x9   :  { %1447 = vmatprep.subr.bf16.mxu0 %v1862_v14  ;;  %v1903_v28 = vpack.c.bf16 %v199_v27, %v194_v25  ;;  %v204_v31 = vld [vmem:[%s2750_s1 + $0x150] sm:$0xff]  ;;  %v1916_v32 = vpack.c.bf16 %v210_v30, %v205_v29  ;;  %v209_v33 = vld [vmem:[%s2750_s1 + $0x178] sm:$0xff]  ;;  %v215_v35 = vld [vmem:[%s2750_s1 + $0x1a8] sm:$0xff] }
   0xa   :  { %v1921_v34 = vpack.c.bf16 %v209_v33, %v204_v31  ;;  %v220_v36 = vld [vmem:[%s2750_s1 + $0x1d0] sm:$0xff]  ;;  %v214_v37 = vld [vmem:[%s2750_s1 + $0x1a0] sm:$0xff]  ;;  %v219_v39 = vld [vmem:[%s2750_s1 + $0x1c8] sm:$0xff] }
   0xb   :  { %v1934_v38 = vpack.c.bf16 %v220_v36, %v215_v35  ;;  %v1939_v40 = vpack.c.bf16 %v219_v39, %v214_v37  ;;  %v225_v41 = vld [vmem:[%s2750_s1 + $0x1f8] sm:$0xff]  ;;  %v230_v42 = vld [vmem:[%s2750_s1 + $0x220] sm:$0xff]  ;;  %v224_v43 = vld [vmem:[%s2750_s1 + $0x1f0] sm:$0xff] }
   0xc   :  { %1449 = vmatpush1.bf16.msra.mxu0 %v1867_v16  ;;  %v1952_v44 = vpack.c.bf16 %v230_v42, %v225_v41  ;;  %v229_v45 = vld [vmem:[%s2750_s1 + $0x218] sm:$0xff]  ;;  %v235_v47 = vld [vmem:[%s2750_s1 + $0x248] sm:$0xff]  ;;  %v240_v48 = vld [vmem:[%s2750_s1 + $0x270] sm:$0xff]  ;;  %v1766_v41 = vmov 839922192  }
   0xd   :  { %1451 = vmatprep.subr.bf16.mxu0 %v1880_v20  ;;  %v1957_v46 = vpack.c.bf16 %v229_v45, %v224_v43  ;;  %v234_v49 = vld [vmem:[%s2750_s1 + $0x240] sm:$0xff]  ;;  %v1970_v50 = vpack.c.bf16 %v240_v48, %v235_v47  ;;  %v239_v51 = vld [vmem:[%s2750_s1 + $0x268] sm:$0xff]  ;;  %v245_v53 = vld [vmem:[%s2750_s1 + $0x298] sm:$0xff]  ;;  %v43_v42 = vunpack.c.l.s4 %v1766_v41  ;;  %v45_v43 = vlaneseq }
   0xe   :  { %v1975_v52 = vpack.c.bf16 %v239_v51, %v234_v49  ;;  %v250_v54 = vld [vmem:[%s2750_s1 + $0x2c0] sm:$0xff]  ;;  %v244_v55 = vld [vmem:[%s2750_s1 + $0x290] sm:$0xff]  ;;  %v249_v57 = vld [vmem:[%s2750_s1 + $0x2b8] sm:$0xff] }
   0xf   :  { %v1988_v56 = vpack.c.bf16 %v250_v54, %v245_v53  ;;  %v1993_v58 = vpack.c.bf16 %v249_v57, %v244_v55  ;;  %v255_v59 = vld [vmem:[%s2750_s1 + $0x2e8] sm:$0xff]  ;;  %v260_v60 = vld [vmem:[%s2750_s1 + $0x310] sm:$0xff]  ;;  %v254_v61 = vld [vmem:[%s2750_s1 + $0x2e0] sm:$0xff]  ;;  %v44_v45 = vunpack.c.0.s8 %v43_v42  ;;  %v46_v47 = vshrl.u32 %v45_v43, 7 }
  0x10   :  { %1453 = vmatpush1.bf16.msra.mxu0 %v1885_v22  ;;  %v2006_v62 = vpack.c.bf16 %v260_v60, %v255_v59  ;;  %v259_v63 = vld [vmem:[%s2750_s1 + $0x308] sm:$0xff]  ;;  %v265_v1 = vld [vmem:[%s2750_s1 + $0x338] sm:$0xff]  ;;  %v270_v2 = vld [vmem:[%s2750_s1 + $0x360] sm:$0xff] }
  0x11   :  { %1455 = vmatprep.subr.bf16.mxu0 %v1898_v26  ;;  %v2011_v0 = vpack.c.bf16 %v259_v63, %v254_v61  ;;  %v264_v4 = vld [vmem:[%s2750_s1 + $0x330] sm:$0xff]  ;;  %v2024_v5 = vpack.c.bf16 %v270_v2, %v265_v1  ;;  %v269_v6 = vld [vmem:[%s2750_s1 + $0x358] sm:$0xff]  ;;  %v275_v8 = vld [vmem:[%s2750_s1 + $0x388] sm:$0xff]  ;;  %v47_v48 = vsub.s32 %v44_v45, %v46_v47 }
  0x12   :  { %v2029_v7 = vpack.c.bf16 %v269_v6, %v264_v4  ;;  %v280_v11 = vld [vmem:[%s2750_s1 + $0x3b0] sm:$0xff]  ;;  %v274_v12 = vld [vmem:[%s2750_s1 + $0x380] sm:$0xff]  ;;  %v279_v15 = vld [vmem:[%s2750_s1 + $0x3a8] sm:$0xff] }
  0x13   :  { %v2042_v13 = vpack.c.bf16 %v280_v11, %v275_v8  ;;  %v2047_v17 = vpack.c.bf16 %v279_v15, %v274_v12  ;;  %v285_v18 = vld [vmem:[%s2750_s1 + $0x3d8] sm:$0xff]  ;;  %v290_v19 = vld [vmem:[%s2750_s1 + $0x400] sm:$0xff]  ;;  %v284_v21 = vld [vmem:[%s2750_s1 + $0x3d0] sm:$0xff] }
  0x14   :  { %1457 = vmatpush1.bf16.msra.mxu0 %v1903_v28  ;;  %v2060_v23 = vpack.c.bf16 %v290_v19, %v285_v18  ;;  %v289_v24 = vld [vmem:[%s2750_s1 + $0x3f8] sm:$0xff]  ;;  %v295_v27 = vld [vmem:[%s2750_s1 + $0x428] sm:$0xff]  ;;  %v300_v29 = vld [vmem:[%s2750_s1 + $0x450] sm:$0xff] }
  0x15   :  { %1459 = vmatprep.subr.bf16.mxu0 %v1916_v32  ;;  %v2065_v25 = vpack.c.bf16 %v289_v24, %v284_v21  ;;  %v294_v30 = vld [vmem:[%s2750_s1 + $0x420] sm:$0xff]  ;;  %v2078_v31 = vpack.c.bf16 %v300_v29, %v295_v27  ;;  %v299_v33 = vld [vmem:[%s2750_s1 + $0x448] sm:$0xff]  ;;  %v305_v36 = vld [vmem:[%s2750_s1 + $0x478] sm:$0xff] }
  0x16   :  { %v2083_v35 = vpack.c.bf16 %v299_v33, %v294_v30  ;;  %v310_v37 = vld [vmem:[%s2750_s1 + $0x4a0] sm:$0xff]  ;;  %v2099_v53 = vld [vmem:[%s2749_s0 + $0x8] sm:$0xff]  ;;  %v168_v2 = vld [vmem:[%s2750_s1 + $0x30] sm:$0xff] }
  0x17   :  { %v2092_v39 = vpack.c.bf16 %v310_v37, %v305_v36  ;;  %2791 = vst [vmem:[#allocation5_spill] sm:$0xff] %v2099_v53  ;;  %v2104_v54 = vld [vmem:[%s2749_s0] sm:$0xff]  ;;  %v163_v1 = vld [vmem:[%s2750_s1 + $0x8] sm:$0xff]  ;;  %v173_v11 = vld [vmem:[%s2750_s1 + $0x58] sm:$0xff] }
  0x18   :  { %1461 = vmatpush1.bf16.msra.mxu0 %v1921_v34  ;;  %v162_v6 = vld [vmem:[%s2750_s1] sm:$0xff]  ;;  %v167_v8 = vld [vmem:[%s2750_s1 + $0x28] sm:$0xff]  ;;  %v2128_v18 = vpack.c.bf16 %v168_v2, %v163_v1  ;;  %v172_v27 = vld [vmem:[%s2750_s1 + $0x50] sm:$0xff] }
  0x19   :  { %1463 = vmatprep.subr.bf16.mxu0 %v1934_v38  ;;  %v178_v12 = vld [vmem:[%s2750_s1 + $0x80] sm:$0xff]  ;;  %v2135_v21 = vpack.c.bf16 %v167_v8, %v162_v6  ;;  %v177_v29 = vld [vmem:[%s2750_s1 + $0x78] sm:$0xff]  ;;  %v183_v30 = vld [vmem:[%s2750_s1 + $0xa8] sm:$0xff] }
  0x1a   :  { %v2133_v19 = vld [vmem:[%s2753_s4] sm:$0xf]  ;;  %v2138_v24 = vpack.c.bf16 %v178_v12, %v173_v11  ;;  %v188_v33 = vld [vmem:[%s2750_s1 + $0xd0] sm:$0xff]  ;;  %v2157_v36 = vpack.c.bf16 %v177_v29, %v172_v27  ;;  %v187_v42 = vld [vmem:[%s2750_s1 + $0xc8] sm:$0xff] }
  0x1b   :  { %v2160_v37 = vpack.c.bf16 %v188_v33, %v183_v30  ;;  %v182_v41 = vld [vmem:[%s2750_s1 + $0xa0] sm:$0xff]  ;;  %v193_v43 = vld [vmem:[%s2750_s1 + $0xf8] sm:$0xff]  ;;  %v207_v1 = vld [vmem:[%s2750_s1 + $0x168] sm:$0xff] }
  0x1c   :  { %1465 = vmatpush1.bf16.msra.mxu0 %v1939_v40  ;;  %v198_v45 = vld [vmem:[%s2750_s1 + $0x120] sm:$0xff]  ;;  %v2175_v47 = vpack.c.bf16 %v187_v42, %v182_v41  ;;  %v213_v2 = vld [vmem:[%s2750_s1 + $0x198] sm:$0xff]  ;;  %v212_v11 = vld [vmem:[%s2750_s1 + $0x190] sm:$0xff] }
  0x1d   :  { %1467 = vmatprep.subr.bf16.mxu0 %v1952_v44  ;;  %v217_v12 = vld [vmem:[%s2750_s1 + $0x1b8] sm:$0xff]  ;;  %v228_v27 = vld [vmem:[%s2750_s1 + $0x210] sm:$0xff]  ;;  %v222_v33 = vld [vmem:[%s2750_s1 + $0x1e0] sm:$0xff] }
  0x1e   :  { %v2229_v29 = vpack.c.bf16 %v217_v12, %v212_v11  ;;  %v227_v41 = vld [vmem:[%s2750_s1 + $0x208] sm:$0xff]  ;;  %v233_v42 = vld [vmem:[%s2750_s1 + $0x238] sm:$0xff] }
  0x1f   :  { %v247_v11 = vld [vmem:[%s2750_s1 + $0x2a8] sm:$0xff]  ;;  %v253_v12 = vld [vmem:[%s2750_s1 + $0x2d8] sm:$0xff] }
  0x20   :  { %1469 = vmatpush1.bf16.msra.mxu0 %v1957_v46  ;;  %v287_v3 = vld [vmem:[%s2750_s1 + $0x3e8] sm:$0xff] }
  0x21   :  { %1471 = vmatprep.subr.bf16.mxu0 %v1970_v50 }
  0x24   :  { %1473 = vmatpush1.bf16.msra.mxu0 %v1975_v52 }
  0x25   :  { %1475 = vmatprep.subr.bf16.mxu0 %v1988_v56 }
  0x28   :  { %1477 = vmatpush1.bf16.msra.mxu0 %v1993_v58 }
  0x29   :  { %1479 = vmatprep.subr.bf16.mxu0 %v2006_v62 }
  0x2c   :  { %1481 = vmatpush1.bf16.msra.mxu0 %v2011_v0 }
  0x2d   :  { %1483 = vmatprep.subr.bf16.mxu0 %v2024_v5 }
  0x30   :  { %1485 = vmatpush1.bf16.msra.mxu0 %v2029_v7 }
  0x31   :  { %1487 = vmatprep.subr.bf16.mxu0 %v2042_v13 }
  0x34   :  { %1489 = vmatpush1.bf16.msra.mxu0 %v2047_v17 }
  0x35   :  { %1491 = vmatprep.subr.bf16.mxu0 %v2060_v23 }
  0x38   :  { %1493 = vmatpush1.bf16.msra.mxu0 %v2065_v25 }
  0x39   :  { %1495 = vmatprep.subr.bf16.mxu0 %v2078_v31 }
  0x3c   :  { %1497 = vmatpush1.bf16.msra.mxu0 %v2083_v35 }
  0x3d   :  { %1499 = vmatprep.subr.bf16.mxu0 %v2092_v39 }
  0x81   :  { %v41_v49 = vpop.permute.xlu0 %40 }
  0x82   :  { %v48_v51 = vrot.slane %v41_v49, %v47_v48  ;;  %v192_v49 = vld [vmem:[%s2750_s1 + $0xf0] sm:$0xff] }
  0x84   :  { %v50_v57 = vmul.f32 %v48_v51, %v2104_v54  ;;  %v728_v59 = vmul.f32 %v2099_v53, %v48_v51  ;;  %v197_v51 = vld [vmem:[%s2750_s1 + $0x118] sm:$0xff] }
  0x85   :  { %v55_v55 = vpop.permute.xlu0 %54  ;;  %v293_v53 = vld [vmem:[%s2750_s1 + $0x418] sm:$0xff] }
  0x86   :  { %v62_v60 = vrot.slane %v55_v55, %v47_v48  ;;  %v2178_v48 = vpack.c.bf16 %v198_v45, %v193_v43  ;;  %v203_v55 = vld [vmem:[%s2750_s1 + $0x148] sm:$0xff]  ;;  %v238_v43 = vld [vmem:[%s2750_s1 + $0x260] sm:$0xff]  ;;  %v2247_v45 = vpack.c.bf16 %v227_v41, %v222_v33  ;;  %v252_v41 = vld [vmem:[%s2750_s1 + $0x2d0] sm:$0xff] }
  0x88   :  { %v64_v61 = vadd.f32 %v62_v60, %v50_v57  ;;  %v2108_v63 = vadd.f32 %v728_v59, %v62_v60  ;;  %v208_v57 = vld [vmem:[%s2750_s1 + $0x170] sm:$0xff]  ;;  %v2193_v59 = vpack.c.bf16 %v197_v51, %v192_v49  ;;  %v2250_v49 = vpack.c.bf16 %v238_v43, %v233_v42  ;;  %v257_v42 = vld [vmem:[%s2750_s1 + $0x2f8] sm:$0xff]  ;;  %v263_v43 = vld [vmem:[%s2750_s1 + $0x328] sm:$0xff] }
  0x89   :  { %v2196_v60 = vpack.c.bf16 %v208_v57, %v203_v55  ;;  %v232_v51 = vld [vmem:[%s2750_s1 + $0x230] sm:$0xff]  ;;  %v237_v55 = vld [vmem:[%s2750_s1 + $0x258] sm:$0xff]  ;;  %v243_v57 = vld [vmem:[%s2750_s1 + $0x288] sm:$0xff] }
  0x8a   :  { %v65_v4 = vmax.f32 %v64_v61, 0.0  ;;  %v202_v61 = vld [vmem:[%s2750_s1 + $0x140] sm:$0xff] }
  0x8b   :  { %v2211_v6 = vpack.c.bf16 %v207_v1, %v202_v61  ;;  %v248_v61 = vld [vmem:[%s2750_s1 + $0x2b0] sm:$0xff]  ;;  %v2265_v1 = vpack.c.bf16 %v237_v55, %v232_v51  ;;  %v2301_v55 = vpack.c.bf16 %v257_v42, %v252_v41 }
  0x8c   :  { %v74_v15 = vcombine.high %v65_v4, %v65_v4  ;;  %v268_v51 = vld [vmem:[%s2750_s1 + $0x350] sm:$0xff] }
  0x8d   :  { %2792 = vst [vmem:[#allocation6_spill] sm:$0xff] %v2265_v1  ;;  %2796 = vst [vmem:[#allocation10_spill] sm:$0xff] %v2301_v55  ;;  %v272_v42 = vld [vmem:[%s2750_s1 + $0x370] sm:$0xff] }
  0x8e   :  { %1215 = vmatprep.subr.msk.mxu1 %vm79_vm0, %v74_v15  ;;  %v223_v15 = vld [vmem:[%s2750_s1 + $0x1e8] sm:$0xff] }
  0x8f   :  { %1216 = vmatpush1.msk.msra.mxu1 %vm79_vm0, %v65_v4  ;;  %v218_v4 = vld [vmem:[%s2750_s1 + $0x1c0] sm:$0xff]  ;;  %v2232_v30 = vpack.c.bf16 %v228_v27, %v223_v15 }
  0x90   :  { %1217 = vmatmul.mubr.msk.f32.vlgmr.msra.gmra.mrb[0].mxu1 %vm75_vm1, %v2133_v19  ;;  %1379 = vmatprep.subr.bf16.mxu1 %v2128_v18  ;;  %v2214_v8 = vpack.c.bf16 %v218_v4, %v213_v2  ;;  %v2268_v2 = vpack.c.bf16 %v248_v61, %v243_v57  ;;  %v242_v4 = vld [vmem:[%s2750_s1 + $0x280] sm:$0xff]  ;;  %v2304_v57 = vpack.c.bf16 %v268_v51, %v263_v43  ;;  %v277_v43 = vld [vmem:[%s2750_s1 + $0x398] sm:$0xff]  ;;  %v283_v51 = vld [vmem:[%s2750_s1 + $0x3c8] sm:$0xff] }
  0x91   :  { %1381 = vmatpush1.bf16.msra.mxu1 %v2135_v21  ;;  %v258_v15 = vld [vmem:[%s2750_s1 + $0x300] sm:$0xff]  ;;  %v2283_v27 = vpack.c.bf16 %v247_v11, %v242_v4  ;;  %v267_v4 = vld [vmem:[%s2750_s1 + $0x348] sm:$0xff]  ;;  %v273_v11 = vld [vmem:[%s2750_s1 + $0x378] sm:$0xff] }
  0x92   :  { %1383 = vmatprep.subr.bf16.mxu1 %v2138_v24  ;;  %2793 = vst [vmem:[#allocation7_spill] sm:$0xff] %v2268_v2  ;;  %v2286_v33 = vpack.c.bf16 %v258_v15, %v253_v12  ;;  %2797 = vst [vmem:[#allocation11_spill] sm:$0xff] %v2304_v57  ;;  %v262_v61 = vld [vmem:[%s2750_s1 + $0x320] sm:$0xff] }
  0x93   :  { %2794 = vst [vmem:[#allocation8_spill] sm:$0xff] %v2283_v27  ;;  %v278_v12 = vld [vmem:[%s2750_s1 + $0x3a0] sm:$0xff]  ;;  %v2319_v15 = vpack.c.bf16 %v267_v4, %v262_v61  ;;  %v288_v61 = vld [vmem:[%s2750_s1 + $0x3f0] sm:$0xff]  ;;  %v2337_v4 = vpack.c.bf16 %v277_v43, %v272_v42 }
  0x94   :  { %2795 = vst [vmem:[#allocation9_spill] sm:$0xff] %v2286_v33  ;;  %v2322_v41 = vpack.c.bf16 %v278_v12, %v273_v11  ;;  %v2340_v11 = vpack.c.bf16 %v288_v61, %v283_v51  ;;  %v282_v12 = vld [vmem:[%s2750_s1 + $0x3c0] sm:$0xff]  ;;  %v292_v61 = vld [vmem:[%s2750_s1 + $0x410] sm:$0xff] }
  0x95   :  { %1385 = vmatpush1.bf16.msra.mxu1 %v2157_v36  ;;  %2798 = vst [vmem:[#allocation12_spill] sm:$0xff] %v2319_v15  ;;  %2800 = vst [vmem:[#allocation14_spill] sm:$0xff] %v2337_v4  ;;  %v298_v42 = vld [vmem:[%s2750_s1 + $0x440] sm:$0xff]  ;;  %v2355_v43 = vpack.c.bf16 %v287_v3, %v282_v12  ;;  %v308_v3 = vld [vmem:[%s2750_s1 + $0x490] sm:$0xff] }
  0x96   :  { %1387 = vmatprep.subr.bf16.mxu1 %v2160_v37  ;;  %2799 = vst [vmem:[#allocation13_spill] sm:$0xff] %v2322_v41  ;;  %2801 = vst [vmem:[#allocation15_spill] sm:$0xff] %v2340_v11  ;;  %v2358_v51 = vpack.c.bf16 %v298_v42, %v293_v53  ;;  %v302_v42 = vld [vmem:[%s2750_s1 + $0x460] sm:$0xff] }
  0x97   :  { %2802 = vst [vmem:[#allocation16_spill] sm:$0xff] %v2355_v43 }
  0x98   :  { %2803 = vst [vmem:[#allocation17_spill] sm:$0xff] %v2358_v51 }
  0x99   :  { %1389 = vmatpush1.bf16.msra.mxu1 %v2175_v47 }
  0x9a   :  { %1391 = vmatprep.subr.bf16.mxu1 %v2178_v48 }
  0x9d   :  { %1393 = vmatpush1.bf16.msra.mxu1 %v2193_v59 }
  0x9e   :  { %1395 = vmatprep.subr.bf16.mxu1 %v2196_v60 }
  0xa1   :  { %1397 = vmatpush1.bf16.msra.mxu1 %v2211_v6 }
  0xa2   :  { %1399 = vmatprep.subr.bf16.mxu1 %v2214_v8 }
  0xa5   :  { %1401 = vmatpush1.bf16.msra.mxu1 %v2229_v29 }
  0xa6   :  { %1403 = vmatprep.subr.bf16.mxu1 %v2232_v30 }
  0xa9   :  { %1405 = vmatpush1.bf16.msra.mxu1 %v2247_v45 }
  0xaa   :  { %1407 = vmatprep.subr.bf16.mxu1 %v2250_v49 }
  0xad   :  { %1409 = vmatpush1.bf16.msra.mxu1 %v2265_v1 }
  0xae   :  { %1411 = vmatprep.subr.bf16.mxu1 %v2268_v2  ;;  %v181_v2 = vld [vmem:[%s2750_s1 + $0x98] sm:$0xff] }
  0xb1   :  { %1413 = vmatpush1.bf16.msra.mxu1 %v2283_v27 }
  0xb2   :  { %1415 = vmatprep.subr.bf16.mxu1 %v2286_v33 }
  0xb5   :  { %1417 = vmatpush1.bf16.msra.mxu1 %v2301_v55  ;;  %v256_v55 = vld [vmem:[%s2750_s1 + $0x2f0] sm:$0xff] }
  0xb6   :  { %1419 = vmatprep.subr.bf16.mxu1 %v2304_v57 }
  0xb9   :  { %1421 = vmatpush1.bf16.msra.mxu1 %v2319_v15  ;;  %v303_v15 = vld [vmem:[%s2750_s1 + $0x468] sm:$0xff] }
  0xba   :  { %1423 = vmatprep.subr.bf16.mxu1 %v2322_v41  ;;  %v297_v41 = vld [vmem:[%s2750_s1 + $0x438] sm:$0xff]  ;;  %v2376_v12 = vpack.c.bf16 %v308_v3, %v303_v15 }
  0xbb   :  { %v2373_v53 = vpack.c.bf16 %v297_v41, %v292_v61  ;;  %v304_v41 = vld [vmem:[%s2750_s1 + $0x470] sm:$0xff]  ;;  %v309_v15 = vld [vmem:[%s2750_s1 + $0x498] sm:$0xff] }
  0xbc   :  { %2805 = vst [vmem:[#allocation19_spill] sm:$0xff] %v2376_v12  ;;  %v2394_v61 = vpack.c.bf16 %v309_v15, %v304_v41  ;;  %v313_v3 = vld [vmem:[%s2750_s1 + $0x4b8] sm:$0xff]  ;;  %v315_v15 = vld [vmem:[%s2750_s1 + $0x4c8] sm:$0xff] }
  0xbd   :  { %1425 = vmatpush1.bf16.msra.mxu1 %v2337_v4  ;;  %2804 = vst [vmem:[#allocation18_spill] sm:$0xff] %v2373_v53  ;;  %v317_v41 = vld [vmem:[%s2750_s1 + $0x4d8] sm:$0xff] }
  0xbe   :  { %1427 = vmatprep.subr.bf16.mxu1 %v2340_v11  ;;  %v307_v11 = vld [vmem:[%s2750_s1 + $0x488] sm:$0xff]  ;;  %1501 = vmatpush1.bf16.msra.mxu0 %v2394_v61 }
  0xbf   :  { %v2386_v4 = vpack.c.bf16 %v307_v11, %v302_v42  ;;  %v318_v11 = vld [vmem:[%s2750_s1 + $0x4e0] sm:$0xff] }
  0xc0   :  { %v2404_v42 = vpack.c.bf16 %v318_v11, %v313_v3  ;;  %v314_v3 = vld [vmem:[%s2750_s1 + $0x4c0] sm:$0xff]  ;;  %v319_v11 = vld [vmem:[%s2750_s1 + $0x4e8] sm:$0xff] }
  0xc1   :  { %1429 = vmatpush1.bf16.msra.mxu1 %v2355_v43  ;;  %2806 = vst [vmem:[#allocation20_spill] sm:$0xff] %v2386_v4  ;;  %v2429_v43 = vpack.c.bf16 %v319_v11, %v314_v3 }
  0xc2   :  { %1431 = vmatprep.subr.bf16.mxu1 %v2358_v51  ;;  %2807 = vst [vmem:[#allocation21_spill] sm:$0xff] %v2404_v42 }
  0xc5   :  { %1433 = vmatpush1.bf16.msra.mxu1 %v2373_v53  ;;  %v320_v53 = vld [vmem:[%s2750_s1 + $0x4f0] sm:$0xff] }
  0xc6   :  { %1435 = vmatprep.subr.bf16.mxu1 %v2376_v12  ;;  %v312_v12 = vld [vmem:[%s2750_s1 + $0x4b0] sm:$0xff]  ;;  %v2427_v51 = vpack.c.bf16 %v320_v53, %v315_v15  ;;  %v2443_v53 = vpop.permute.xlu1 %70 }
  0xc7   :  { %2810 = vst [vmem:[#allocation24_spill] sm:$0xff] %v2443_v53 }
  0xc8   :  { %1503 = vmatprep.subr.bf16.mxu0 %v2427_v51 }
  0xc9   :  { %1437 = vmatpush1.bf16.msra.mxu1 %v2386_v4  ;;  %v2415_v4 = vpack.c.bf16 %v317_v41, %v312_v12  ;;  %v246_v12 = vld [vmem:[%s2750_s1 + $0x2a0] sm:$0xff]  ;;  %v251_v41 = vld [vmem:[%s2750_s1 + $0x2c8] sm:$0xff]  ;;  %1505 = vmatpush1.bf16.msra.mxu0 %v2429_v43 }
  0xca   :  { %1439 = vmatprep.subr.bf16.mxu1 %v2404_v42  ;;  %v2439_v57 = vpack.c.bf16 %v251_v41, %v246_v12  ;;  %v166_v42 = vld [vmem:[%s2750_s1 + $0x20] sm:$0xff]  ;;  %v171_v12 = vld [vmem:[%s2750_s1 + $0x48] sm:$0xff]  ;;  %v158_v41 = vcombine.low %v2104_v54, %v2104_v54 }
  0xcb   :  { %2808 = vst [vmem:[#allocation22_spill] sm:$0xff] %v2415_v4 }
  0xcc   :  { %2809 = vst [vmem:[#allocation23_spill] sm:$0xff] %v2439_v57 }
  0xcd   :  { %1441 = vmatpush1.bf16.msra.mxu1 %v2415_v4 }
  0xce   :  { %1507 = vmatprep.subr.bf16.mxu1 %v2439_v57 }
 0x163   :  { %v150_v15 = vpop.f32.mrb[0].mxu1 }
 0x164   :  { %v151_v3 = vadd.f32 %v150_v15, %v2443_v53  ;;  %v152_v11 = vpop.f32.mrb[1].mxu1  ;;  %v261_v15 = vld [vmem:[%s2750_s1 + $0x318] sm:$0xff] }
 0x165   :  { %v153_v4 = vadd.f32 %v152_v11, %v2443_v53  ;;  %v2461_v53 = vpack.c.bf16 %v171_v12, %v166_v42  ;;  %v2465_v27 = vpack.c.bf16 %v261_v15, %v256_v55  ;;  %v191_v12 = vld [vmem:[%s2750_s1 + $0xe8] sm:$0xff] }
 0x166   :  { %v155_v57 = vmax.f32 %v151_v3, 0.0  ;;  %v176_v3 = vld [vmem:[%s2750_s1 + $0x70] sm:$0xff] }
 0x167   :  { %v156_v11 = vmax.f32 %v153_v4, 0.0  ;;  %v266_v4 = vld [vmem:[%s2750_s1 + $0x340] sm:$0xff]  ;;  %v2481_v55 = vpack.c.bf16 %v181_v2, %v176_v3  ;;  %v281_v2 = vld [vmem:[%s2750_s1 + $0x3b8] sm:$0xff] }
 0x168   :  { %v160_v1 = vsel %vm79_vm0, %v155_v57, %v158_v41  ;;  %v186_v57 = vld [vmem:[%s2750_s1 + $0xc0] sm:$0xff]  ;;  %v276_v41 = vld [vmem:[%s2750_s1 + $0x390] sm:$0xff]  ;;  %v201_v3 = vld [vmem:[%s2750_s1 + $0x138] sm:$0xff] }
 0x169   :  { %v161_v33 = vsel %vm79_vm0, %v156_v11, %v2104_v54  ;;  %v271_v54 = vld [vmem:[%s2750_s1 + $0x368] sm:$0xff]  ;;  %v2502_v15 = vpack.c.bf16 %v281_v2, %v276_v41  ;;  %v196_v11 = vld [vmem:[%s2750_s1 + $0x110] sm:$0xff]  ;;  %v206_v41 = vld [vmem:[%s2750_s1 + $0x160] sm:$0xff] }
 0x16a   :  { %386 = vmatprep.mubr.f32.mxu1 %v161_v33  ;;  %457 = vmatprep.mubr.f32.mxu0 %v161_v33  ;;  %v2484_v42 = vpack.c.bf16 %v271_v54, %v266_v4  ;;  %v286_v4 = vld [vmem:[%s2750_s1 + $0x3e0] sm:$0xff]  ;;  %v291_v54 = vld [vmem:[%s2750_s1 + $0x408] sm:$0xff] }
 0x16b   :  { %387 = vmatmul.mubr.f32.vlgmr.msra.gmra.mrb[2].mxu1 %v160_v1  ;;  %458 = vmatmul.mubr.f32.vlgmr.msra.gmra.mrb[0].mxu0 %v160_v1  ;;  %2813 = vst [vmem:[#allocation27_spill] sm:$0xff] %v2502_v15  ;;  %v211_v2 = vld [vmem:[%s2750_s1 + $0x188] sm:$0xff] }
 0x16c   :  { %1509 = vmatpush3.bf16.msra.mxu1 %v2461_v53  ;;  %528 = vmatprep.mubr.f32.mxu1 %v161_v33  ;;  %2811 = vst [vmem:[#allocation25_spill] sm:$0xff] %v2484_v42  ;;  %v2499_v33 = vpack.c.bf16 %v191_v12, %v186_v57  ;;  %v2517_v57 = vpack.c.bf16 %v201_v3, %v196_v11  ;;  %v301_v11 = vld [vmem:[%s2750_s1 + $0x458] sm:$0xff] }
 0x16d   :  { %1511 = vmatprep.subr.bf16.mxu1 %v2465_v27  ;;  %v2520_v12 = vpack.c.bf16 %v291_v54, %v286_v4  ;;  %v2535_v3 = vpack.c.bf16 %v211_v2, %v206_v41  ;;  %v216_v54 = vld [vmem:[%s2750_s1 + $0x1b0] sm:$0xff]  ;;  %v311_v41 = vld [vmem:[%s2750_s1 + $0x4a8] sm:$0xff] }
 0x16e   :  { %2812 = vst [vmem:[#allocation26_spill] sm:$0xff] %v2499_v33  ;;  %2814 = vst [vmem:[#allocation28_spill] sm:$0xff] %v2517_v57 }
 0x16f   :  { %2815 = vst [vmem:[#allocation29_spill] sm:$0xff] %v2520_v12  ;;  %2816 = vst [vmem:[#allocation30_spill] sm:$0xff] %v2535_v3 }
 0x170   :  { %1513 = vmatpush3.bf16.msra.mxu1 %v2481_v55 }
 0x171   :  { %1515 = vmatprep.subr.bf16.mxu1 %v2484_v42  ;;  %v296_v42 = vld [vmem:[%s2750_s1 + $0x430] sm:$0xff] }
 0x172   :  { %v2538_v4 = vpack.c.bf16 %v301_v11, %v296_v42  ;;  %v226_v11 = vld [vmem:[%s2750_s1 + $0x200] sm:$0xff] }
 0x174   :  { %1517 = vmatpush3.bf16.msra.mxu1 %v2499_v33  ;;  %2817 = vst [vmem:[#allocation31_spill] sm:$0xff] %v2538_v4  ;;  %v306_v33 = vld [vmem:[%s2750_s1 + $0x480] sm:$0xff] }
 0x175   :  { %1519 = vmatprep.subr.bf16.mxu1 %v2502_v15  ;;  %v221_v15 = vld [vmem:[%s2750_s1 + $0x1d8] sm:$0xff]  ;;  %v2556_v2 = vpack.c.bf16 %v311_v41, %v306_v33  ;;  %v236_v41 = vld [vmem:[%s2750_s1 + $0x250] sm:$0xff] }
 0x176   :  { %v2553_v42 = vpack.c.bf16 %v221_v15, %v216_v54  ;;  %v321_v15 = vld [vmem:[%s2750_s1 + $0x4f8] sm:$0xff] }
 0x178   :  { %1521 = vmatpush3.bf16.msra.mxu1 %v2517_v57  ;;  %v316_v57 = vld [vmem:[%s2750_s1 + $0x4d0] sm:$0xff] }
 0x179   :  { %1523 = vmatprep.subr.bf16.mxu1 %v2520_v12  ;;  %v231_v12 = vld [vmem:[%s2750_s1 + $0x228] sm:$0xff]  ;;  %v2574_v54 = vpack.c.bf16 %v321_v15, %v316_v57 }
 0x17a   :  { %v2571_v33 = vpack.c.bf16 %v231_v12, %v226_v11  ;;  %v2838_v11 = vld [vmem:[#allocation5_spill] sm:$0xff] }
 0x17b   :  { %v811_v15 = vcombine.low %v2838_v11, %v2838_v11 }
 0x17c   :  { %1525 = vmatpush3.bf16.msra.mxu1 %v2535_v3 }
 0x17d   :  { %1527 = vmatprep.subr.bf16.mxu1 %v2538_v4  ;;  %v241_v4 = vld [vmem:[%s2750_s1 + $0x278] sm:$0xff]  ;;  %s1767_s1 = smov 64  }
 0x17e   :  { %v2583_v3 = vpack.c.bf16 %v241_v4, %v236_v41 }
 0x180   :  { %1529 = vmatpush3.bf16.msra.mxu1 %v2553_v42 }
 0x181   :  { %1531 = vmatprep.subr.bf16.mxu1 %v2556_v2 }
 0x184   :  { %1533 = vmatpush3.bf16.msra.mxu1 %v2571_v33 }
 0x185   :  { %1535 = vmatprep.subr.bf16.mxu1 %v2574_v54 }
 0x188   :  { %1537 = vmatpush3.bf16.msra.mxu1 %v2583_v3 }
 0x189   :  { %1619 = vmatprep.subr.bf16.mxu1 %v1847_v9 }
 0x18b   :  { %529 = vmatmul.mubr.f32.vlgmr.msra.gmra.mrb[4].mxu1 %v160_v1 }
 0x18c   :  { %1621 = vmatpush1.bf16.msra.mxu1 %v1849_v10 }
 0x18d   :  { %1623 = vmatprep.subr.bf16.mxu1 %v1862_v14 }
 0x190   :  { %1625 = vmatpush1.bf16.msra.mxu1 %v1867_v16 }
 0x191   :  { %1627 = vmatprep.subr.bf16.mxu1 %v1880_v20  ;;  %v634_v20 = vld [vmem:[%s2756_s7] sm:$0xf] }
 0x194   :  { %1629 = vmatpush1.bf16.msra.mxu1 %v1885_v22  ;;  %v2629_v22 = vld [vmem:[%s2755_s6] sm:$0xff] }
 0x195   :  { %1631 = vmatprep.subr.bf16.mxu1 %v1898_v26  ;;  %1344 = vmatprep.mubr.msk.f32.mxu0 %vm552_vm2, %v2629_v22 }
 0x198   :  { %1633 = vmatpush1.bf16.msra.mxu1 %v1903_v28 }
 0x199   :  { %1635 = vmatprep.subr.bf16.mxu1 %v1916_v32 }
 0x19c   :  { %1637 = vmatpush1.bf16.msra.mxu1 %v1921_v34 }
 0x19d   :  { %1639 = vmatprep.subr.bf16.mxu1 %v1934_v38 }
 0x1a0   :  { %1641 = vmatpush1.bf16.msra.mxu1 %v1939_v40 }
 0x1a1   :  { %1643 = vmatprep.subr.bf16.mxu1 %v1952_v44 }
 0x1a4   :  { %1645 = vmatpush1.bf16.msra.mxu1 %v1957_v46 }
 0x1a5   :  { %1647 = vmatprep.subr.bf16.mxu1 %v1970_v50 }
 0x1a8   :  { %1649 = vmatpush1.bf16.msra.mxu1 %v1975_v52 }
 0x1a9   :  { %1651 = vmatprep.subr.bf16.mxu1 %v1988_v56 }
 0x1ac   :  { %1653 = vmatpush1.bf16.msra.mxu1 %v1993_v58  ;;  %v2636_v58 = vld [vmem:[%s2755_s6 + $0x8] sm:$0xf] }
 0x1ad   :  { %1655 = vmatprep.subr.bf16.mxu1 %v2006_v62  ;;  %v2818_v62 = vmov 0.0  }
 0x1b0   :  { %1657 = vmatpush1.bf16.msra.mxu1 %v2011_v0  ;;  %v730_v0 = vmax.f32 %v2108_v63, 0.0  ;;  %v2821_v63 = vld [vmem:[#allocation8_spill] sm:$0xff] }
 0x1b1   :  { %1659 = vmatprep.subr.bf16.mxu1 %v2024_v5 }
 0x1b4   :  { %1661 = vmatpush1.bf16.msra.mxu1 %v2029_v7 }
 0x1b5   :  { %1663 = vmatprep.subr.bf16.mxu1 %v2042_v13 }
 0x1b8   :  { %1665 = vmatpush1.bf16.msra.mxu1 %v2047_v17 }
 0x1b9   :  { %1667 = vmatprep.subr.bf16.mxu1 %v2060_v23 }
 0x1bc   :  { %1669 = vmatpush1.bf16.msra.mxu1 %v2065_v25  ;;  %v2650_v25 = vld [vmem:[%s2757_s8] sm:$0xff] }
 0x1bd   :  { %1671 = vmatprep.subr.bf16.mxu1 %v2078_v31  ;;  %v732_v31 = vcombine.high %v730_v0, %v730_v0 }
 0x1c0   :  { %1673 = vmatpush1.bf16.msra.mxu1 %v2083_v35  ;;  %v2819_v35 = vld [vmem:[#allocation6_spill] sm:$0xff] }
 0x1c1   :  { %1675 = vmatprep.subr.bf16.mxu1 %v2092_v39  ;;  %v2820_v39 = vld [vmem:[#allocation7_spill] sm:$0xff] }
 0x1c4   :  { %1677 = vmatpush1.bf16.msra.mxu1 %v2394_v61  ;;  %v2837_v61 = vld [vmem:[#allocation24_spill] sm:$0xff] }
 0x1c5   :  { %1679 = vmatprep.subr.bf16.mxu1 %v2427_v51 }
 0x1c8   :  { %1681 = vmatpush1.bf16.msra.mxu1 %v2429_v43 }
 0x23e   :  { %v388_v9 = vpop.f32.mrb[2].mxu1  ;;  %v459_v10 = vpop.f32.mrb[0].mxu0 }
 0x23f   :  { %v461_v14 = vpop.f32.mrb[1].mxu0  ;;  %535 = vrot.lane.b32.xlu1 %v388_v9, %s1767_s1  ;;  %v390_v16 = vpop.f32.mrb[3].mxu1 }
 0x240   :  { %539 = vrot.lane.b32.xlu0 %v390_v16, %s1767_s1 }
 0x243   :  { %543 = vrot.lane.b32.xlu1 %v459_v10, %s1767_s1 }
 0x244   :  { %547 = vrot.lane.b32.xlu0 %v461_v14, %s1767_s1 }
 0x247   :  { %637 = vperm.xlu1 %1737, %v634_v20   ;;  %v2840_v20 = vld [vmem:[#allocation26_spill] sm:$0xff] }
 0x25e   :  { %v1262_v26 = vpop.f32.mrb[4].mxu1 }
 0x25f   :  { %v1263_v28 = vpop.f32.mrb[5].mxu1 }
 0x260   :  { %v1264_v32 = vadd.f32 %v1263_v28, %v1262_v26  ;;  %v2841_v26 = vld [vmem:[#allocation27_spill] sm:$0xff]  ;;  %v2842_v28 = vld [vmem:[#allocation28_spill] sm:$0xff] }
 0x2b1   :  { %v536_v34 = vpop.permute.xlu1 %535 }
 0x2b2   :  { %v1538_v38 = vpack.c.bf16 %v536_v34, %v388_v9  ;;  %v540_v40 = vpop.permute.xlu0 %539  ;;  %v2844_v34 = vld [vmem:[#allocation30_spill] sm:$0xff] }
 0x2b3   :  { %v1542_v44 = vpack.c.bf16 %v540_v40, %v390_v16  ;;  %v2839_v16 = vld [vmem:[#allocation25_spill] sm:$0xff] }
 0x2b4   :  { %1539 = vmatprep.subr.bf16.mxu0 %v1538_v38 }
 0x2b5   :  { %1541 = vmatpush3.bf16.msra.mxu0 %v1538_v38  ;;  %v544_v46 = vpop.permute.xlu1 %543 }
 0x2b6   :  { %1543 = vmatprep.subr.bf16.mxu0 %v1542_v44  ;;  %v1546_v50 = vpack.c.bf16 %v544_v46, %v459_v10  ;;  %v548_v52 = vpop.permute.xlu0 %547 }
 0x2b7   :  { %v1550_v56 = vpack.c.bf16 %v548_v52, %v461_v14 }
 0x2b9   :  { %1545 = vmatpush3.bf16.msra.mxu0 %v1542_v44 }
 0x2ba   :  { %1547 = vmatprep.subr.bf16.mxu0 %v1546_v50 }
 0x2bd   :  { %1549 = vmatpush3.bf16.msra.mxu0 %v1546_v50 }
 0x2be   :  { %1551 = vmatprep.subr.bf16.mxu0 %v1550_v56 }
 0x2c1   :  { %1553 = vmatpush3.bf16.msra.mxu0 %v1550_v56 }
 0x2c2   :  { %1342 = vmatprep.subr.mxu0 %v1264_v32 }
 0x2c5   :  { %1343 = vmatpush3.msra.mxu0 %v1264_v32  ;;  %v2843_v32 = vld [vmem:[#allocation29_spill] sm:$0xff] }
 0x2c6   :  { %1345 = vmatmul.mubr.msk.f32.vlgmr.msra.gmra.mrb[2].mxu0 %vm552_vm2, %v2636_v58  ;;  %1347 = vmatprep.subr.mxu0 %v2818_v62  ;;  %v2644_v5 = vpop.permute.xlu1 %637 }
 0x2c7   :  { %1349 = vmatprep.mubr.msk.f32.mxu0 %vm1768_vm3, %v2818_v62 }
 0x399   :  { %v1346_v7 = vpop.f32.mrb[2].mxu0 }
 0x39a   :  { %v640_v13 = vadd.f32 %v1346_v7, %v2644_v5  ;;  %v625_v17 = vpop.f32.mrb[3].mxu0 }
 0x39c   :  { %v641_v23 = vmax.f32 %v640_v13, 0.0 }
 0x39e   :  { %1348 = vmatpush3.msk.msra.mxu0 %vm79_vm0, %v641_v23 }
 0x39f   :  { %1350 = vmatmul.mubr.msk.f32.vlgmr.msra.gmra.mrb[4].mxu0 %vm75_vm1, %v2650_v25  ;;  %1223 = vmatprep.subr.msk.mxu0 %vm79_vm0, %v732_v31 }
 0x3a0   :  { %1224 = vmatpush1.msk.msra.mxu0 %vm79_vm0, %v730_v0  ;;  %801 = vmatprep.mubr.f32.mxu0 %v2818_v62 }
 0x3a1   :  { %1555 = vmatprep.subr.bf16.mxu0 %v2128_v18  ;;  %v2822_v18 = vld [vmem:[#allocation9_spill] sm:$0xff] }
 0x3a3   :  { %1225 = vmatmul.mubr.msk.f32.vlgmr.msra.gmra.mrb[6].mxu0 %vm75_vm1, %v2133_v19  ;;  %v2823_v19 = vld [vmem:[#allocation10_spill] sm:$0xff] }
 0x3a4   :  { %1557 = vmatpush1.bf16.msra.mxu0 %v2135_v21  ;;  %v2824_v21 = vld [vmem:[#allocation11_spill] sm:$0xff] }
 0x3a5   :  { %1559 = vmatprep.subr.bf16.mxu0 %v2138_v24  ;;  %v2825_v24 = vld [vmem:[#allocation12_spill] sm:$0xff] }
 0x3a8   :  { %1561 = vmatpush1.bf16.msra.mxu0 %v2157_v36  ;;  %v2826_v36 = vld [vmem:[#allocation13_spill] sm:$0xff] }
 0x3a9   :  { %1563 = vmatprep.subr.bf16.mxu0 %v2160_v37  ;;  %v2827_v37 = vld [vmem:[#allocation14_spill] sm:$0xff] }
 0x3ac   :  { %1565 = vmatpush1.bf16.msra.mxu0 %v2175_v47  ;;  %v2828_v47 = vld [vmem:[#allocation15_spill] sm:$0xff] }
 0x3ad   :  { %1567 = vmatprep.subr.bf16.mxu0 %v2178_v48  ;;  %v2829_v48 = vld [vmem:[#allocation16_spill] sm:$0xff] }
 0x3b0   :  { %1569 = vmatpush1.bf16.msra.mxu0 %v2193_v59  ;;  %v2830_v59 = vld [vmem:[#allocation17_spill] sm:$0xff] }
 0x3b1   :  { %1571 = vmatprep.subr.bf16.mxu0 %v2196_v60  ;;  %v2831_v60 = vld [vmem:[#allocation18_spill] sm:$0xff] }
 0x3b4   :  { %1573 = vmatpush1.bf16.msra.mxu0 %v2211_v6  ;;  %v2832_v6 = vld [vmem:[#allocation19_spill] sm:$0xff] }
 0x3b5   :  { %1575 = vmatprep.subr.bf16.mxu0 %v2214_v8  ;;  %v2833_v8 = vld [vmem:[#allocation20_spill] sm:$0xff] }
 0x3b8   :  { %1577 = vmatpush1.bf16.msra.mxu0 %v2229_v29  ;;  %v2834_v29 = vld [vmem:[#allocation21_spill] sm:$0xff] }
 0x3b9   :  { %1579 = vmatprep.subr.bf16.mxu0 %v2232_v30  ;;  %v2835_v30 = vld [vmem:[#allocation22_spill] sm:$0xff] }
 0x3bc   :  { %1581 = vmatpush1.bf16.msra.mxu0 %v2247_v45  ;;  %v2836_v45 = vld [vmem:[#allocation23_spill] sm:$0xff] }
 0x3bd   :  { %1583 = vmatprep.subr.bf16.mxu0 %v2250_v49 }
 0x3c0   :  { %1585 = vmatpush1.bf16.msra.mxu0 %v2819_v35 }
 0x3c1   :  { %1587 = vmatprep.subr.bf16.mxu0 %v2820_v39 }
 0x3c4   :  { %1589 = vmatpush1.bf16.msra.mxu0 %v2821_v63 }
 0x3c5   :  { %1591 = vmatprep.subr.bf16.mxu0 %v2822_v18 }
 0x3c8   :  { %1593 = vmatpush1.bf16.msra.mxu0 %v2823_v19 }
 0x3c9   :  { %1595 = vmatprep.subr.bf16.mxu0 %v2824_v21 }
 0x3cc   :  { %1597 = vmatpush1.bf16.msra.mxu0 %v2825_v24 }
 0x3cd   :  { %1599 = vmatprep.subr.bf16.mxu0 %v2826_v36 }
 0x3d0   :  { %1601 = vmatpush1.bf16.msra.mxu0 %v2827_v37 }
 0x3d1   :  { %1603 = vmatprep.subr.bf16.mxu0 %v2828_v47 }
 0x3d4   :  { %1605 = vmatpush1.bf16.msra.mxu0 %v2829_v48 }
 0x3d5   :  { %1607 = vmatprep.subr.bf16.mxu0 %v2830_v59 }
 0x3d8   :  { %1609 = vmatpush1.bf16.msra.mxu0 %v2831_v60 }
 0x3d9   :  { %1611 = vmatprep.subr.bf16.mxu0 %v2832_v6 }
 0x3dc   :  { %1613 = vmatpush1.bf16.msra.mxu0 %v2833_v8 }
 0x3dd   :  { %1615 = vmatprep.subr.bf16.mxu0 %v2834_v29 }
 0x3e0   :  { %1617 = vmatpush1.bf16.msra.mxu0 %v2835_v30 }
 0x3e1   :  { %1683 = vmatprep.subr.bf16.mxu0 %v2836_v45 }
 0x472   :  { %v715_v49 = vpop.f32.mrb[4].mxu0 }
 0x473   :  { %v2693_v1 = vadd.f32 %v715_v49, %v625_v17  ;;  %v1351_v43 = vpop.f32.mrb[5].mxu0 }
 0x476   :  { %v803_v51 = vpop.f32.mrb[6].mxu0 }
 0x477   :  { %v804_v57 = vadd.f32 %v803_v51, %v2837_v61  ;;  %v805_v12 = vpop.f32.mrb[7].mxu0 }
 0x478   :  { %v806_v4 = vadd.f32 %v805_v12, %v2837_v61 }
 0x479   :  { %v808_v41 = vmax.f32 %v804_v57, 0.0 }
 0x47a   :  { %v809_v9 = vmax.f32 %v806_v4, 0.0 }
 0x47b   :  { %v813_v14 = vsel %vm79_vm0, %v808_v41, %v811_v15 }
 0x47c   :  { %v814_v10 = vsel %vm79_vm0, %v809_v9, %v2838_v11 }
 0x47d   :  { %879 = vmatprep.mubr.f32.mxu0 %v814_v10  ;;  %950 = vmatprep.mubr.f32.mxu1 %v814_v10 }
 0x47e   :  { %880 = vmatmul.mubr.f32.vlgmr.msra.gmra.mrb[8].mxu0 %v813_v14  ;;  %951 = vmatmul.mubr.f32.vlgmr.msra.gmra.mrb[6].mxu1 %v813_v14 }
 0x47f   :  { %1685 = vmatpush3.bf16.msra.mxu0 %v2461_v53  ;;  %1021 = vmatprep.mubr.f32.mxu0 %v814_v10  ;;  %v2845_v53 = vld [vmem:[#allocation31_spill] sm:$0xff] }
 0x480   :  { %1687 = vmatprep.subr.bf16.mxu0 %v2465_v27  ;;  %1370 = vmatprep.mubr.msk.f32.mxu1 %vm552_vm2, %v2629_v22 }
 0x483   :  { %1689 = vmatpush3.bf16.msra.mxu0 %v2481_v55 }
 0x484   :  { %1691 = vmatprep.subr.bf16.mxu0 %v2839_v16 }
 0x487   :  { %1693 = vmatpush3.bf16.msra.mxu0 %v2840_v20 }
 0x488   :  { %1695 = vmatprep.subr.bf16.mxu0 %v2841_v26 }
 0x48b   :  { %1697 = vmatpush3.bf16.msra.mxu0 %v2842_v28 }
 0x48c   :  { %1699 = vmatprep.subr.bf16.mxu0 %v2843_v32 }
 0x48f   :  { %1701 = vmatpush3.bf16.msra.mxu0 %v2844_v34 }
 0x490   :  { %1703 = vmatprep.subr.bf16.mxu0 %v2845_v53 }
 0x493   :  { %1705 = vmatpush3.bf16.msra.mxu0 %v2553_v42  ;;  %v719_v42 = vld [vmem:[%s2758_s9] sm:$0xff]  ;;  %s1769_s9 = smov [#allocation2]  }
 0x494   :  { %1707 = vmatprep.subr.bf16.mxu0 %v2556_v2  ;;  %s1207_s13 = sshll.u32 %s1769_s9, 4  ;;  %s1208_s13 = int_to_ptr.vmem [resolvable:$true] %s1207_s13 }
 0x495   :  { %s1740_s14 = scalar_lea.vmem %s1208_s13, 128  ;;  %p1745_p1 = scmp.lt.s32.totalorder %s1208_s13, %s1208_s13 }
 0x496   :  { %p1741_p0 = scmp.ne.s32.totalorder %s1208_s13, %s1740_s14  ;;  %p1746_p2 = scmp.lt.s32.totalorder %s1740_s14, %s1740_s14 }
 0x497   :  { %1709 = vmatpush3.bf16.msra.mxu0 %v2571_v33 }
 0x498   :  { %1711 = vmatprep.subr.bf16.mxu0 %v2574_v54  ;;  %p1747_p3 = por %p1746_p2, %p1745_p1 }
 0x49a   :  { %p1748_p4 = pnand %p1747_p3, %p1741_p0 }
 0x49b   :  { %1713 = vmatpush3.bf16.msra.mxu0 %v2583_v3 }
 0x49e   :  { %1022 = vmatmul.mubr.f32.vlgmr.msra.gmra.mrb[10].mxu0 %v813_v14 }
 0x551   :  { %v881_v27 = vpop.f32.mrb[8].mxu0  ;;  %v952_v55 = vpop.f32.mrb[6].mxu1 }
 0x552   :  { %v954_v22 = vpop.f32.mrb[7].mxu1  ;;  %1028 = vrot.lane.b32.xlu0 %v881_v27, %s1767_s1  ;;  %v883_v38 = vpop.f32.mrb[9].mxu0 }
 0x553   :  { %1032 = vrot.lane.b32.xlu1 %v883_v38, %s1767_s1 }
 0x556   :  { %1036 = vrot.lane.b32.xlu0 %v952_v55, %s1767_s1 }
 0x557   :  { %1040 = vrot.lane.b32.xlu1 %v954_v22, %s1767_s1 }
 0x55a   :  { %722 = vperm.xlu0 %1736, %v719_v42  }
 0x571   :  { %v1310_v2 = vpop.f32.mrb[10].mxu0 }
 0x572   :  { %v1311_v3 = vpop.f32.mrb[11].mxu0 }
 0x573   :  { %v1312_v33 = vadd.f32 %v1311_v3, %v1310_v2 }
 0x5c4   :  { %v1029_v54 = vpop.permute.xlu0 %1028 }
 0x5c5   :  { %v1714_v40 = vpack.c.bf16 %v1029_v54, %v881_v27  ;;  %v1033_v44 = vpop.permute.xlu1 %1032 }
 0x5c6   :  { %v1718_v46 = vpack.c.bf16 %v1033_v44, %v883_v38 }
 0x5c7   :  { %1715 = vmatprep.subr.bf16.mxu1 %v1714_v40 }
 0x5c8   :  { %1717 = vmatpush3.bf16.msra.mxu1 %v1714_v40  ;;  %v1037_v50 = vpop.permute.xlu0 %1036 }
 0x5c9   :  { %1719 = vmatprep.subr.bf16.mxu1 %v1718_v46  ;;  %v1722_v52 = vpack.c.bf16 %v1037_v50, %v952_v55  ;;  %v1041_v56 = vpop.permute.xlu1 %1040 }
 0x5ca   :  { %v1726_v0 = vpack.c.bf16 %v1041_v56, %v954_v22 }
 0x5cc   :  { %1721 = vmatpush3.bf16.msra.mxu1 %v1718_v46 }
 0x5cd   :  { %1723 = vmatprep.subr.bf16.mxu1 %v1722_v52 }
 0x5d0   :  { %1725 = vmatpush3.bf16.msra.mxu1 %v1722_v52 }
 0x5d1   :  { %1727 = vmatprep.subr.bf16.mxu1 %v1726_v0 }
 0x5d4   :  { %1729 = vmatpush3.bf16.msra.mxu1 %v1726_v0 }
 0x5d5   :  { %1368 = vmatprep.subr.mxu1 %v1312_v33 }
 0x5d8   :  { %1369 = vmatpush3.msra.mxu1 %v1312_v33 }
 0x5d9   :  { %1371 = vmatmul.mubr.msk.f32.vlgmr.msra.gmra.mrb[8].mxu1 %vm552_vm2, %v2636_v58  ;;  %1373 = vmatprep.subr.mxu1 %v2818_v62  ;;  %v723_v63 = vpop.permute.xlu0 %722 }
 0x5da   :  { %1375 = vmatprep.mubr.msk.f32.mxu1 %vm1768_vm3, %v2818_v62  ;;  %v725_v62 = vadd.f32 %v723_v63, %v2693_v1 }
 0x6ac   :  { %v1372_v7 = vpop.f32.mrb[8].mxu1 }
 0x6ad   :  { %v1118_v13 = vadd.f32 %v1372_v7, %v2644_v5  ;;  %v1109_v17 = vpop.f32.mrb[9].mxu1 }
 0x6af   :  { %v1119_v23 = vmax.f32 %v1118_v13, 0.0 }
 0x6b1   :  { %1374 = vmatpush3.msk.msra.mxu1 %vm79_vm0, %v1119_v23 }
 0x6b2   :  { %1376 = vmatmul.mubr.msk.f32.vlgmr.msra.gmra.mrb[10].mxu1 %vm75_vm1, %v2650_v25 }
 0x785   :  { %v1189_v31 = vpop.f32.mrb[10].mxu1 }
 0x786   :  { %v1190_v35 = vadd.f32 %v1189_v31, %v1109_v17  ;;  %v1377_v39 = vpop.f32.mrb[11].mxu1 }
 0x788   :  { %v1193_v58 = vadd.f32 %v1190_v35, %v723_v63 }
 0x78a   :  { %1195 = vrot.lane.b32.xlu1 %v1193_v58, %s1767_s1 }
 0x7fc   :  { %v1196_v5 = vpop.permute.xlu1 %1195 }
 0x7fd   :  { %v1199_v18 = vsel %vm1198_vm4, %v725_v62, %v1196_v5 }
 0x7fe   :  { %1200 = vst [vmem:[#allocation2] sm:$0xff] %v1199_v18 }
 0x7ff   :  { %1751 = shalt.err (!%p1748_p4)
}
 0x800   :  { %s1752_s17 = scalar_lea.hbm %s2759_s10, 128 }
 0x801   :  { %p1753_p5 = scmp.ne.s32.totalorder %s2759_s10, %s1752_s17  ;;  %p1756_p6 = scmp.lt.u32.totalorder %s1752_s17, %s2759_s10 }
 0x803   :  { %p1758_p7 = pnand %p1756_p6, %p1753_p5 }
 0x805   :  { %1761 = shalt.err (!%p1758_p7)
}
 0x806   :  { %1210 = dma.vmem_to_hbm [thread:$0]  %s1208_s13, 128, %s2759_s10, [#allocation3]  }
 0x807   :  { %1762 = dma.done.wait [#allocation3], 128  }
 0x808   :  { %1763 = vsyncadd [#allocation3], 4294967168 }
 0x809   :  { %1214 = vsyncpa [#allocation3], 1 }

</bundles_post_ra>
